<compile_context>
chip_gen: v7x
topology: tpu7x:2x2x1
jax: 0.10.0
libtpu: 0.0.40
codegen_flags: <defaults>
</compile_context>

<pallas_src>
import jax
import jax.numpy as jnp
from jax import lax
from jax.experimental import pallas as pl
from jax.experimental.pallas import tpu as pltpu

LANES = 128
QUADRANTS = ((0, 0), (0, 1), (1, 0), (1, 1))


def _round_up(x, m):
    return (x + m - 1) // m * m


# ---------------------------------------------------------------------------
# Pallas kernels
# ---------------------------------------------------------------------------
def _conv_pool_kernel(p_ref, w_ref, b_ref, o_ref):
    """p: (tm, K) bf16 pooled-window patches; w: (K, 4*128) bf16 quadrant weights.
    Computes the four conv outputs of each 2x2 pool block as four 128-lane column
    groups of one matmul, then fuses max-pool + bias + ReLU before the store."""
    y = jnp.dot(p_ref[...], w_ref[...], preferred_element_type=jnp.float32)
    y = jnp.maximum(jnp.maximum(y[:, 0 * LANES:1 * LANES], y[:, 1 * LANES:2 * LANES]),
                    jnp.maximum(y[:, 2 * LANES:3 * LANES], y[:, 3 * LANES:4 * LANES]))
    o_ref[...] = jnp.maximum(y + b_ref[...], 0.0)


def _fc_stack_kernel(x_ref, w1_ref, b1_ref, w2_ref, b2_ref, w3_ref, b3_ref, o_ref):
    """Fused fc1->ReLU->fc2->ReLU->fc3; (tm,120)/(tm,84) intermediates never leave VMEM."""
    h = jnp.dot(x_ref[...], w1_ref[...], preferred_element_type=jnp.float32)
    h = jnp.maximum(h + b1_ref[...], 0.0)
    h = jnp.dot(h, w2_ref[...], preferred_element_type=jnp.float32)
    h = jnp.maximum(h + b2_ref[...], 0.0)
    o_ref[...] = jnp.dot(h, w3_ref[...], preferred_element_type=jnp.float32) + b3_ref[...]


# ---------------------------------------------------------------------------
# pallas_call wrappers (M-tiled, parallel grid, lane-dense outputs)
# ---------------------------------------------------------------------------
def _conv_pool_call(patches, w, b, *, tile_cap=512):
    M, K = patches.shape
    tm = min(tile_cap, _round_up(M, 8))
    Mp = _round_up(M, tm)
    if Mp != M:
        patches = jnp.pad(patches, ((0, Mp - M), (0, 0)))
    nq = w.shape[1]                       # 4 * 128
    flops = 2 * Mp * K * nq
    bytes_acc = (patches.size * patches.dtype.itemsize
                 + w.size * w.dtype.itemsize + b.size * 4 + Mp * LANES * 4)
    return pl.pallas_call(
        _conv_pool_kernel,
        grid=(Mp // tm,),
        in_specs=[
            pl.BlockSpec((tm, K), lambda i: (i, 0)),
            pl.BlockSpec((K, nq), lambda i: (0, 0)),
            pl.BlockSpec((1, LANES), lambda i: (0, 0)),
        ],
        out_specs=pl.BlockSpec((tm, LANES), lambda i: (i, 0)),
        out_shape=jax.ShapeDtypeStruct((Mp, LANES), jnp.float32),
        compiler_params=pltpu.CompilerParams(
            dimension_semantics=("parallel",),
            vmem_limit_bytes=32 * 1024 * 1024),
        cost_estimate=pl.CostEstimate(flops=flops, transcendentals=0,
                                      bytes_accessed=bytes_acc),
    )(patches, w, b)


def _fc_stack_call(x, w1, b1, w2, b2, w3, b3, *, tile_cap=256):
    M, K = x.shape
    tm = min(tile_cap, _round_up(M, 8))
    Mp = _round_up(M, tm)
    if Mp != M:
        x = jnp.pad(x, ((0, Mp - M), (0, 0)))
    flops = 2 * Mp * (K * LANES + LANES * LANES + LANES * LANES)
    bytes_acc = (x.size * x.dtype.itemsize
                 + (w1.size + w2.size + w3.size) * 4 + Mp * LANES * 4)
    return pl.pallas_call(
        _fc_stack_kernel,
        grid=(Mp // tm,),
        in_specs=[
            pl.BlockSpec((tm, K), lambda i: (i, 0)),
            pl.BlockSpec(w1.shape, lambda i: (0, 0)),
            pl.BlockSpec((1, LANES), lambda i: (0, 0)),
            pl.BlockSpec(w2.shape, lambda i: (0, 0)),
            pl.BlockSpec((1, LANES), lambda i: (0, 0)),
            pl.BlockSpec(w3.shape, lambda i: (0, 0)),
            pl.BlockSpec((1, LANES), lambda i: (0, 0)),
        ],
        out_specs=pl.BlockSpec((tm, LANES), lambda i: (i, 0)),
        out_shape=jax.ShapeDtypeStruct((Mp, LANES), jnp.float32),
        compiler_params=pltpu.CompilerParams(
            dimension_semantics=("parallel",),
            vmem_limit_bytes=32 * 1024 * 1024),
        cost_estimate=pl.CostEstimate(flops=flops, transcendentals=0,
                                      bytes_accessed=bytes_acc),
    )(x, w1, b1, w2, b2, w3, b3)


# ---------------------------------------------------------------------------
# Wrapper-side patch extraction (one 6x6xCin window per pooled output pixel)
# ---------------------------------------------------------------------------
def _pooled_windows(x):
    """x: (N, Hp, Wp, Cin), already padded for a 5x5/stride-1 conv followed by a
    2x2/stride-2 max-pool.  Returns (N*Ph*Pw, 36*Cin); each row is the 6x6xCin
    input window feeding one pooled output pixel, flattened in (di, dj, ci) order."""
    N, Hp, Wp, Cin = x.shape
    Ph, Pw = (Hp - 4) // 2, (Wp - 4) // 2
    cols = []
    for di in range(6):
        for dj in range(6):
            cols.append(x[:, di:di + 2 * Ph - 1:2, dj:dj + 2 * Pw - 1:2, :])
    p = jnp.stack(cols, axis=3)                      # (N, Ph, Pw, 36, Cin)
    return p.reshape(N * Ph * Pw, 36 * Cin)


# ---------------------------------------------------------------------------
# One-time parameter packing (hoisted out of the forward pass)
# ---------------------------------------------------------------------------
def _prep_conv(w, b):
    """w: PyTorch (Cout, Cin, 5, 5); b: (Cout,).  Returns a (36*Cin, 4*128) bf16 RHS
    (one 128-lane column group per pool quadrant) and a (1, 128) f32 bias row."""
    Cout, Cin, kh, kw = w.shape
    w_t = jnp.transpose(w, (2, 3, 1, 0))             # (5, 5, Cin, Cout)
    wq = jnp.zeros((6, 6, Cin, 4, LANES), jnp.float32)
    for q, (qh, qw) in enumerate(QUADRANTS):
        wq = wq.at[qh:qh + kh, qw:qw + kw, :, q, :Cout].set(w_t)
    wq = wq.reshape(36 * Cin, 4 * LANES).astype(jnp.bfloat16)
    bq = jnp.zeros((1, LANES), jnp.float32).at[0, :Cout].set(b)
    return wq, bq


def _prep_fc(w, b, *, in_pad=None, perm=None):
    """w: PyTorch (out, in).  Returns ((in|in_pad), 128) f32 weight and (1, 128) bias."""
    out_f, _ = w.shape
    wt = jnp.transpose(w)                            # (in, out)
    if perm is not None:
        wt = wt[perm, :]
    if in_pad is not None and in_pad > wt.shape[0]:
        wt = jnp.pad(wt, ((0, in_pad - wt.shape[0]), (0, 0)))
    wt = jnp.pad(wt, ((0, 0), (0, LANES - out_f)))
    bp = jnp.pad(b, (0, LANES - out_f)).reshape(1, LANES)
    return wt, bp


def prepare_params(params):
    c1_w, c1_b = _prep_conv(params["conv1_w"], params["conv1_b"])
    c2_w, c2_b = _prep_conv(params["conv2_w"], params["conv2_b"])
    # Our post-conv2 flatten order is (spatial s = h*5+w, channel c); PyTorch's
    # x.view(-1, 400) on NCHW is (c, s).  Fold the permutation into fc1's rows.
    s = jnp.arange(25)[:, None]
    c = jnp.arange(16)[None, :]
    perm = (c * 25 + s).reshape(-1)                  # perm[s*16 + c] = c*25 + s
    f1_w, f1_b = _prep_fc(params["fc1_w"], params["fc1_b"], perm=perm)
    f2_w, f2_b = _prep_fc(params["fc2_w"], params["fc2_b"], in_pad=LANES)
    f3_w, f3_b = _prep_fc(params["fc3_w"], params["fc3_b"], in_pad=LANES)
    return dict(c1_w=c1_w, c1_b=c1_b, c2_w=c2_w, c2_b=c2_b,
                f1_w=f1_w, f1_b=f1_b, f2_w=f2_w, f2_b=f2_b, f3_w=f3_w, f3_b=f3_b)


# ---------------------------------------------------------------------------
# Forward pass
# ---------------------------------------------------------------------------
@jax.jit
def net_forward(prepped, x_nchw):
    """x_nchw: (N, 1, 28, 28) float32 — same layout as the PyTorch module."""
    N = x_nchw.shape[0]
    x = jnp.transpose(x_nchw, (0, 2, 3, 1)).astype(jnp.bfloat16)     # NHWC
    x = jnp.pad(x, ((0, 0), (2, 2), (2, 2), (0, 0)))                 # conv1 pad=2

    # conv1 (1->6, 5x5, pad 2) + ReLU + 2x2 max-pool, fused into one kernel.
    p1 = _pooled_windows(x)                                          # (N*14*14, 36)
    h1 = _conv_pool_call(p1, prepped["c1_w"], prepped["c1_b"])       # (*, 128) f32
    h1 = h1[:N * 14 * 14, :6].reshape(N, 14, 14, 6).astype(jnp.bfloat16)

    # conv2 (6->16, 5x5, pad 0) + ReLU + 2x2 max-pool, fused into one kernel.
    p2 = _pooled_windows(h1)                                         # (N*5*5, 216)
    h2 = _conv_pool_call(p2, prepped["c2_w"], prepped["c2_b"])       # (*, 128) f32
    # Rows are (n, h*5+w) with channels in lanes 0:16 -> (N, 400) in (s, c) order;
    # the PyTorch (c, s) flatten is folded into fc1's weight rows.
    h2 = h2[:N * 25, :16].reshape(N, 400)

    # fc1 -> ReLU -> fc2 -> ReLU -> fc3, fused into one kernel.
    out = _fc_stack_call(h2, prepped["f1_w"], prepped["f1_b"],
                         prepped["f2_w"], prepped["f2_b"],
                         prepped["f3_w"], prepped["f3_b"])           # (*, 128)
    return out[:N, :10]


# ---------------------------------------------------------------------------
# Init + pure-XLA reference (for a self-check)
# ---------------------------------------------------------------------------
def init_params(key):
    """Deterministic PyTorch-style U(-1/sqrt(fan_in), 1/sqrt(fan_in)) init."""
    ks = jax.random.split(key, 10)

    def uni(k, shape, fan_in):
        bound = 1.0 / jnp.sqrt(jnp.float32(fan_in))
        return jax.random.uniform(k, shape, jnp.float32, -bound, bound)

    return {
        "conv1_w": uni(ks[0], (6, 1, 5, 5), 1 * 5 * 5),
        "conv1_b": uni(ks[1], (6,), 1 * 5 * 5),
        "conv2_w": uni(ks[2], (16, 6, 5, 5), 6 * 5 * 5),
        "conv2_b": uni(ks[3], (16,), 6 * 5 * 5),
        "fc1_w": uni(ks[4], (120, 400), 400),
        "fc1_b": uni(ks[5], (120,), 400),
        "fc2_w": uni(ks[6], (84, 120), 120),
        "fc2_b": uni(ks[7], (84,), 120),
        "fc3_w": uni(ks[8], (10, 84), 84),
        "fc3_b": uni(ks[9], (10,), 84),
    }


def _reference_forward(params, x):
    """Pure-XLA f32 reference matching the PyTorch module."""
    dn = ("NCHW", "OIHW", "NCHW")
    hi = lax.Precision.HIGHEST
    y = lax.conv_general_dilated(x, params["conv1_w"], (1, 1), ((2, 2), (2, 2)),
                                 dimension_numbers=dn, precision=hi)
    y = jnp.maximum(y + params["conv1_b"][None, :, None, None], 0.0)
    y = lax.reduce_window(y, -jnp.inf, lax.max, (1, 1, 2, 2), (1, 1, 2, 2), "VALID")
    y = lax.conv_general_dilated(y, params["conv2_w"], (1, 1), ((0, 0), (0, 0)),
                                 dimension_numbers=dn, precision=hi)
    y = jnp.maximum(y + params["conv2_b"][None, :, None, None], 0.0)
    y = lax.reduce_window(y, -jnp.inf, lax.max, (1, 1, 2, 2), (1, 1, 2, 2), "VALID")
    y = y.reshape(y.shape[0], -1)
    y = jnp.maximum(jnp.dot(y, params["fc1_w"].T, precision=hi) + params["fc1_b"], 0.0)
    y = jnp.maximum(jnp.dot(y, params["fc2_w"].T, precision=hi) + params["fc2_b"], 0.0)
    return jnp.dot(y, params["fc3_w"].T, precision=hi) + params["fc3_b"]


if __name__ == "__main__":
    key = jax.random.PRNGKey(0)
    pkey, xkey = jax.random.split(key)
    params = init_params(pkey)
    prepped = prepare_params(params)          # one-time weight packing (hoisted)
    # LeNet geometry requires 28x28 single-channel input (16*5*5 flatten).
    x = jax.random.normal(xkey, (2, 1, 28, 28), jnp.float32)
    out = jax.block_until_ready(net_forward(prepped, x))
    assert out.shape == (2, 10) and out.dtype == jnp.float32
    ref = _reference_forward(params, x)
    assert jnp.allclose(out, ref, atol=5e-2, rtol=5e-2)
    print("KERNEL_OK")
</pallas_src>

<mosaic_0001>
module attributes {stable_mosaic.version = 11 : i64} {
  func.func @_conv_pool_kernel(%arg0: i32, %arg1: memref<392x36xbf16, #tpu.memory_space<vmem>>, %arg2: memref<36x512xbf16, #tpu.memory_space<vmem>>, %arg3: memref<1x128xf32, #tpu.memory_space<vmem>>, %arg4: memref<392x128xf32, #tpu.memory_space<vmem>>) attributes {dimension_semantics = [#tpu.dimension_semantics<parallel>], iteration_bounds = array<i64: 1>, scalar_prefetch = 0 : i64, scratch_operands = 0 : i64, tpu.core_type = #tpu.core_type<tc>, window_params = [{transform_indices = @transform_0, window_bounds = array<i64: 392, 36>}, {pipeline_mode = #tpu.pipeline_mode<synchronous>, transform_indices = @transform_1, window_bounds = array<i64: 36, 512>}, {pipeline_mode = #tpu.pipeline_mode<synchronous>, transform_indices = @transform_2, window_bounds = array<i64: 1, 128>}, {transform_indices = @transform_3, window_bounds = array<i64: 392, 128>}]} {
    %c0 = arith.constant 0 : index
    %c0_0 = arith.constant 0 : index
    %0 = vector.load %arg1[%c0, %c0_0] : memref<392x36xbf16, #tpu.memory_space<vmem>>, vector<392x36xbf16>
    %c0_1 = arith.constant 0 : index
    %c0_2 = arith.constant 0 : index
    %1 = vector.load %arg2[%c0_1, %c0_2] : memref<36x512xbf16, #tpu.memory_space<vmem>>, vector<36x512xbf16>
    %cst = arith.constant dense<0.000000e+00> : vector<392x512xf32>
    %2 = tpu.matmul %0, %1, %cst {dimension_numbers = #tpu.dot_dimension_numbers<[1], [0], [0], [1], [0, 0, 1, 1], [], []>} : vector<392x36xbf16>, vector<36x512xbf16>, vector<392x512xf32> -> vector<392x512xf32>
    %3 = vector.extract_strided_slice %2 {offsets = [0, 0], sizes = [392, 128], strides = [1, 1]} : vector<392x512xf32> to vector<392x128xf32>
    %4 = vector.extract_strided_slice %2 {offsets = [0, 128], sizes = [392, 128], strides = [1, 1]} : vector<392x512xf32> to vector<392x128xf32>
    %5 = arith.maximumf %3, %4 : vector<392x128xf32>
    %6 = vector.extract_strided_slice %2 {offsets = [0, 256], sizes = [392, 128], strides = [1, 1]} : vector<392x512xf32> to vector<392x128xf32>
    %7 = vector.extract_strided_slice %2 {offsets = [0, 384], sizes = [392, 128], strides = [1, 1]} : vector<392x512xf32> to vector<392x128xf32>
    %8 = arith.maximumf %6, %7 : vector<392x128xf32>
    %9 = arith.maximumf %5, %8 : vector<392x128xf32>
    %c0_3 = arith.constant 0 : index
    %c0_4 = arith.constant 0 : index
    %10 = vector.load %arg3[%c0_3, %c0_4] : memref<1x128xf32, #tpu.memory_space<vmem>>, vector<1x128xf32>
    %11 = vector.broadcast %10 : vector<1x128xf32> to vector<392x128xf32>
    %12 = arith.addf %9, %11 : vector<392x128xf32>
    %cst_5 = arith.constant 0.000000e+00 : f32
    %13 = vector.broadcast %cst_5 : f32 to vector<392x128xf32>
    %14 = arith.maximumf %12, %13 : vector<392x128xf32>
    %c0_6 = arith.constant 0 : index
    %c0_7 = arith.constant 0 : index
    %15 = vector.load %arg4[%c0_6, %c0_7] : memref<392x128xf32, #tpu.memory_space<vmem>>, vector<392x128xf32>
    tpu.vector_store %arg4[%c0_6, %c0_7], %14 {strides = array<i32>} : memref<392x128xf32, #tpu.memory_space<vmem>>, vector<392x128xf32>,
    return
  }
  func.func @transform_0(%arg0: i32) -> (i32, i32) {
    %c0_i32 = arith.constant 0 : i32
    %c0_i32_0 = arith.constant 0 : i32
    return %arg0, %c0_i32 : i32, i32
  }
  func.func @transform_1(%arg0: i32) -> (i32, i32) {
    %c0_i32 = arith.constant 0 : i32
    %c0_i32_0 = arith.constant 0 : i32
    %c0_i32_1 = arith.constant 0 : i32
    return %c0_i32, %c0_i32_0 : i32, i32
  }
  func.func @transform_2(%arg0: i32) -> (i32, i32) {
    %c0_i32 = arith.constant 0 : i32
    %c0_i32_0 = arith.constant 0 : i32
    %c0_i32_1 = arith.constant 0 : i32
    return %c0_i32, %c0_i32_0 : i32, i32
  }
  func.func @transform_3(%arg0: i32) -> (i32, i32) {
    %c0_i32 = arith.constant 0 : i32
    %c0_i32_0 = arith.constant 0 : i32
    return %arg0, %c0_i32 : i32, i32
  }
}

module attributes {stable_mosaic.version = 11 : i64} {
  func.func @_conv_pool_kernel(%arg0: i32, %arg1: memref<56x216xbf16, #tpu.memory_space<vmem>>, %arg2: memref<216x512xbf16, #tpu.memory_space<vmem>>, %arg3: memref<1x128xf32, #tpu.memory_space<vmem>>, %arg4: memref<56x128xf32, #tpu.memory_space<vmem>>) attributes {dimension_semantics = [#tpu.dimension_semantics<parallel>], iteration_bounds = array<i64: 1>, scalar_prefetch = 0 : i64, scratch_operands = 0 : i64, tpu.core_type = #tpu.core_type<tc>, window_params = [{transform_indices = @transform_0, window_bounds = array<i64: 56, 216>}, {pipeline_mode = #tpu.pipeline_mode<synchronous>, transform_indices = @transform_1, window_bounds = array<i64: 216, 512>}, {pipeline_mode = #tpu.pipeline_mode<synchronous>, transform_indices = @transform_2, window_bounds = array<i64: 1, 128>}, {transform_indices = @transform_3, window_bounds = array<i64: 56, 128>}]} {
    %c0 = arith.constant 0 : index
    %c0_0 = arith.constant 0 : index
    %0 = vector.load %arg1[%c0, %c0_0] : memref<56x216xbf16, #tpu.memory_space<vmem>>, vector<56x216xbf16>
    %c0_1 = arith.constant 0 : index
    %c0_2 = arith.constant 0 : index
    %1 = vector.load %arg2[%c0_1, %c0_2] : memref<216x512xbf16, #tpu.memory_space<vmem>>, vector<216x512xbf16>
    %cst = arith.constant dense<0.000000e+00> : vector<56x512xf32>
    %2 = tpu.matmul %0, %1, %cst {dimension_numbers = #tpu.dot_dimension_numbers<[1], [0], [0], [1], [0, 0, 1, 1], [], []>} : vector<56x216xbf16>, vector<216x512xbf16>, vector<56x512xf32> -> vector<56x512xf32>
    %3 = vector.extract_strided_slice %2 {offsets = [0, 0], sizes = [56, 128], strides = [1, 1]} : vector<56x512xf32> to vector<56x128xf32>
    %4 = vector.extract_strided_slice %2 {offsets = [0, 128], sizes = [56, 128], strides = [1, 1]} : vector<56x512xf32> to vector<56x128xf32>
    %5 = arith.maximumf %3, %4 : vector<56x128xf32>
    %6 = vector.extract_strided_slice %2 {offsets = [0, 256], sizes = [56, 128], strides = [1, 1]} : vector<56x512xf32> to vector<56x128xf32>
    %7 = vector.extract_strided_slice %2 {offsets = [0, 384], sizes = [56, 128], strides = [1, 1]} : vector<56x512xf32> to vector<56x128xf32>
    %8 = arith.maximumf %6, %7 : vector<56x128xf32>
    %9 = arith.maximumf %5, %8 : vector<56x128xf32>
    %c0_3 = arith.constant 0 : index
    %c0_4 = arith.constant 0 : index
    %10 = vector.load %arg3[%c0_3, %c0_4] : memref<1x128xf32, #tpu.memory_space<vmem>>, vector<1x128xf32>
    %11 = vector.broadcast %10 : vector<1x128xf32> to vector<56x128xf32>
    %12 = arith.addf %9, %11 : vector<56x128xf32>
    %cst_5 = arith.constant 0.000000e+00 : f32
    %13 = vector.broadcast %cst_5 : f32 to vector<56x128xf32>
    %14 = arith.maximumf %12, %13 : vector<56x128xf32>
    %c0_6 = arith.constant 0 : index
    %c0_7 = arith.constant 0 : index
    %15 = vector.load %arg4[%c0_6, %c0_7] : memref<56x128xf32, #tpu.memory_space<vmem>>, vector<56x128xf32>
    tpu.vector_store %arg4[%c0_6, %c0_7], %14 {strides = array<i32>} : memref<56x128xf32, #tpu.memory_space<vmem>>, vector<56x128xf32>,
    return
  }
  func.func @transform_0(%arg0: i32) -> (i32, i32) {
    %c0_i32 = arith.constant 0 : i32
    %c0_i32_0 = arith.constant 0 : i32
    return %arg0, %c0_i32 : i32, i32
  }
  func.func @transform_1(%arg0: i32) -> (i32, i32) {
    %c0_i32 = arith.constant 0 : i32
    %c0_i32_0 = arith.constant 0 : i32
    %c0_i32_1 = arith.constant 0 : i32
    return %c0_i32, %c0_i32_0 : i32, i32
  }
  func.func @transform_2(%arg0: i32) -> (i32, i32) {
    %c0_i32 = arith.constant 0 : i32
    %c0_i32_0 = arith.constant 0 : i32
    %c0_i32_1 = arith.constant 0 : i32
    return %c0_i32, %c0_i32_0 : i32, i32
  }
  func.func @transform_3(%arg0: i32) -> (i32, i32) {
    %c0_i32 = arith.constant 0 : i32
    %c0_i32_0 = arith.constant 0 : i32
    return %arg0, %c0_i32 : i32, i32
  }
}

module attributes {stable_mosaic.version = 11 : i64} {
  func.func @_fc_stack_kernel(%arg0: i32, %arg1: memref<8x400xf32, #tpu.memory_space<vmem>>, %arg2: memref<400x128xf32, #tpu.memory_space<vmem>>, %arg3: memref<1x128xf32, #tpu.memory_space<vmem>>, %arg4: memref<128x128xf32, #tpu.memory_space<vmem>>, %arg5: memref<1x128xf32, #tpu.memory_space<vmem>>, %arg6: memref<128x128xf32, #tpu.memory_space<vmem>>, %arg7: memref<1x128xf32, #tpu.memory_space<vmem>>, %arg8: memref<8x128xf32, #tpu.memory_space<vmem>>) attributes {dimension_semantics = [#tpu.dimension_semantics<parallel>], iteration_bounds = array<i64: 1>, scalar_prefetch = 0 : i64, scratch_operands = 0 : i64, tpu.core_type = #tpu.core_type<tc>, window_params = [{transform_indices = @transform_0, window_bounds = array<i64: 8, 400>}, {pipeline_mode = #tpu.pipeline_mode<synchronous>, transform_indices = @transform_1, window_bounds = array<i64: 400, 128>}, {pipeline_mode = #tpu.pipeline_mode<synchronous>, transform_indices = @transform_2, window_bounds = array<i64: 1, 128>}, {pipeline_mode = #tpu.pipeline_mode<synchronous>, transform_indices = @transform_3, window_bounds = array<i64: 128, 128>}, {pipeline_mode = #tpu.pipeline_mode<synchronous>, transform_indices = @transform_4, window_bounds = array<i64: 1, 128>}, {pipeline_mode = #tpu.pipeline_mode<synchronous>, transform_indices = @transform_5, window_bounds = array<i64: 128, 128>}, {pipeline_mode = #tpu.pipeline_mode<synchronous>, transform_indices = @transform_6, window_bounds = array<i64: 1, 128>}, {transform_indices = @transform_7, window_bounds = array<i64: 8, 128>}]} {
    %c0 = arith.constant 0 : index
    %c0_0 = arith.constant 0 : index
    %0 = vector.load %arg1[%c0, %c0_0] : memref<8x400xf32, #tpu.memory_space<vmem>>, vector<8x400xf32>
    %c0_1 = arith.constant 0 : index
    %c0_2 = arith.constant 0 : index
    %1 = vector.load %arg2[%c0_1, %c0_2] : memref<400x128xf32, #tpu.memory_space<vmem>>, vector<400x128xf32>
    %cst = arith.constant dense<0.000000e+00> : vector<8x128xf32>
    %2 = tpu.matmul %0, %1, %cst {dimension_numbers = #tpu.dot_dimension_numbers<[1], [0], [0], [1], [0, 0, 1, 1], [], []>} : vector<8x400xf32>, vector<400x128xf32>, vector<8x128xf32> -> vector<8x128xf32>
    %c0_3 = arith.constant 0 : index
    %c0_4 = arith.constant 0 : index
    %3 = vector.load %arg3[%c0_3, %c0_4] : memref<1x128xf32, #tpu.memory_space<vmem>>, vector<1x128xf32>
    %4 = vector.broadcast %3 : vector<1x128xf32> to vector<8x128xf32>
    %5 = arith.addf %2, %4 : vector<8x128xf32>
    %cst_5 = arith.constant 0.000000e+00 : f32
    %6 = vector.broadcast %cst_5 : f32 to vector<8x128xf32>
    %7 = arith.maximumf %5, %6 : vector<8x128xf32>
    %c0_6 = arith.constant 0 : index
    %c0_7 = arith.constant 0 : index
    %8 = vector.load %arg4[%c0_6, %c0_7] : memref<128x128xf32, #tpu.memory_space<vmem>>, vector<128x128xf32>
    %cst_8 = arith.constant dense<0.000000e+00> : vector<8x128xf32>
    %9 = tpu.matmul %7, %8, %cst_8 {dimension_numbers = #tpu.dot_dimension_numbers<[1], [0], [0], [1], [0, 0, 1, 1], [], []>} : vector<8x128xf32>, vector<128x128xf32>, vector<8x128xf32> -> vector<8x128xf32>
    %c0_9 = arith.constant 0 : index
    %c0_10 = arith.constant 0 : index
    %10 = vector.load %arg5[%c0_9, %c0_10] : memref<1x128xf32, #tpu.memory_space<vmem>>, vector<1x128xf32>
    %11 = vector.broadcast %10 : vector<1x128xf32> to vector<8x128xf32>
    %12 = arith.addf %9, %11 : vector<8x128xf32>
    %cst_11 = arith.constant 0.000000e+00 : f32
    %13 = vector.broadcast %cst_11 : f32 to vector<8x128xf32>
    %14 = arith.maximumf %12, %13 : vector<8x128xf32>
    %c0_12 = arith.constant 0 : index
    %c0_13 = arith.constant 0 : index
    %15 = vector.load %arg6[%c0_12, %c0_13] : memref<128x128xf32, #tpu.memory_space<vmem>>, vector<128x128xf32>
    %cst_14 = arith.constant dense<0.000000e+00> : vector<8x128xf32>
    %16 = tpu.matmul %14, %15, %cst_14 {dimension_numbers = #tpu.dot_dimension_numbers<[1], [0], [0], [1], [0, 0, 1, 1], [], []>} : vector<8x128xf32>, vector<128x128xf32>, vector<8x128xf32> -> vector<8x128xf32>
    %c0_15 = arith.constant 0 : index
    %c0_16 = arith.constant 0 : index
    %17 = vector.load %arg7[%c0_15, %c0_16] : memref<1x128xf32, #tpu.memory_space<vmem>>, vector<1x128xf32>
    %18 = vector.broadcast %17 : vector<1x128xf32> to vector<8x128xf32>
    %19 = arith.addf %16, %18 : vector<8x128xf32>
    %c0_17 = arith.constant 0 : index
    %c0_18 = arith.constant 0 : index
    %20 = vector.load %arg8[%c0_17, %c0_18] : memref<8x128xf32, #tpu.memory_space<vmem>>, vector<8x128xf32>
    tpu.vector_store %arg8[%c0_17, %c0_18], %19 {strides = array<i32>} : memref<8x128xf32, #tpu.memory_space<vmem>>, vector<8x128xf32>,
    return
  }
  func.func @transform_0(%arg0: i32) -> (i32, i32) {
    %c0_i32 = arith.constant 0 : i32
    %c0_i32_0 = arith.constant 0 : i32
    return %arg0, %c0_i32 : i32, i32
  }
  func.func @transform_1(%arg0: i32) -> (i32, i32) {
    %c0_i32 = arith.constant 0 : i32
    %c0_i32_0 = arith.constant 0 : i32
    %c0_i32_1 = arith.constant 0 : i32
    return %c0_i32, %c0_i32_0 : i32, i32
  }
  func.func @transform_2(%arg0: i32) -> (i32, i32) {
    %c0_i32 = arith.constant 0 : i32
    %c0_i32_0 = arith.constant 0 : i32
    %c0_i32_1 = arith.constant 0 : i32
    return %c0_i32, %c0_i32_0 : i32, i32
  }
  func.func @transform_3(%arg0: i32) -> (i32, i32) {
    %c0_i32 = arith.constant 0 : i32
    %c0_i32_0 = arith.constant 0 : i32
    %c0_i32_1 = arith.constant 0 : i32
    return %c0_i32, %c0_i32_0 : i32, i32
  }
  func.func @transform_4(%arg0: i32) -> (i32, i32) {
    %c0_i32 = arith.constant 0 : i32
    %c0_i32_0 = arith.constant 0 : i32
    %c0_i32_1 = arith.constant 0 : i32
    return %c0_i32, %c0_i32_0 : i32, i32
  }
  func.func @transform_5(%arg0: i32) -> (i32, i32) {
    %c0_i32 = arith.constant 0 : i32
    %c0_i32_0 = arith.constant 0 : i32
    %c0_i32_1 = arith.constant 0 : i32
    return %c0_i32, %c0_i32_0 : i32, i32
  }
  func.func @transform_6(%arg0: i32) -> (i32, i32) {
    %c0_i32 = arith.constant 0 : i32
    %c0_i32_0 = arith.constant 0 : i32
    %c0_i32_1 = arith.constant 0 : i32
    return %c0_i32, %c0_i32_0 : i32, i32
  }
  func.func @transform_7(%arg0: i32) -> (i32, i32) {
    %c0_i32 = arith.constant 0 : i32
    %c0_i32_0 = arith.constant 0 : i32
    return %arg0, %c0_i32 : i32, i32
  }
}

</mosaic_0001>

<bundles_post_ra>
// kernel: net_forward.3
= control target key start
LH: loop header
LB: loop body
LE: loop exit
PB: predicated region body
PF: predicated region fallthrough
CT: control target
= control target key end

     0   :  { %v1335_v1 = vmov 0   ;;  %vm323_vm0 = vcmask 1041408   ;;  %vm247_vm1 = vcmask 293888   ;;  %s1766_s1 = inlined_call_operand.vmem [shape: bf16[36,512], index: 1, kind: input, shape index: {}]   ;;  %s1767_s0 = inlined_call_operand.vmem [shape: bf16[392,36], index: 0, kind: input, shape index: {}]   ;;  %s1768_s2 = inlined_call_operand.vmem [shape: f32[1,128], index: 2, kind: input, shape index: {}]   ;;  %s1769_s3 = inlined_call_operand.vmem [shape: f32[392,128], index: 3, kind: output, shape index: {}]  }
   0x1   :  { %v1294_v0 = vld [vmem:[%s1766_s1 + $0x4] ss:$16 sps:$4 sm:$0xff]   ;;  %368 = vmatprep.mubr.bf16.mxu0 %v1335_v1  ;;  %649 = vmatprep.mubr.bf16.mxu1 %v1335_v1  ;;  %v1296_v2 = vld [vmem:[%s1766_s1 + $0xc] ss:$16 sps:$4 sm:$0xff]   ;;  %v1298_v3 = vld [vmem:[%s1766_s1] ss:$16 sps:$4 sm:$0xff]  }
   0x2   :  { %336 = vmatprep.subr.bf16.mxu0 %v1294_v0  ;;  %v1299_v4 = vld [vmem:[%s1766_s1 + $0x8] ss:$16 sps:$4 sm:$0xff]   ;;  %617 = vmatprep.subr.bf16.mxu1 %v1296_v2  ;;  %v1300_v5 = vld [vmem:[%s1766_s1 + $0x24] ss:$16 sps:$4 sm:$0xff]   ;;  %v1302_v6 = vld [vmem:[%s1766_s1 + $0x2c] ss:$16 sps:$4 sm:$0xff]  }
   0x3   :  { %337 = vmatpush1.bf16.msra.mxu0 %v1298_v3  ;;  %618 = vmatpush1.bf16.msra.mxu1 %v1299_v4  ;;  %v1304_v7 = vld [vmem:[%s1766_s1 + $0x20] ss:$16 sps:$4 sm:$0xff]   ;;  %v1305_v8 = vld [vmem:[%s1766_s1 + $0x28] ss:$16 sps:$4 sm:$0xff]  }
   0x4   :  { %338 = vmatprep.subr.bf16.mxu0 %v1300_v5  ;;  %v72_v9 = vld [vmem:[%s1766_s1 + $0x40] sm:$0x33]  ;;  %v73_v10 = vld [vmem:[%s1766_s1 + $0x48] sm:$0x33]  ;;  %619 = vmatprep.subr.bf16.mxu1 %v1302_v6  ;;  %v1312_v19 = vld [vmem:[%s1767_s0 + $0x10] sm:$0xff]  }
   0x5   :  { %v1237_v11 = vcombine.high %v72_v9, %v72_v9  ;;  %v1239_v12 = vcombine.high %v73_v10, %v73_v10  ;;  %v1236_v13 = vcombine.low %v72_v9, %v72_v9  ;;  %v1238_v14 = vcombine.low %v73_v10, %v73_v10  ;;  %v1310_v17 = vld [vmem:[%s1767_s0] sm:$0xff]   ;;  %v1311_v18 = vld [vmem:[%s1767_s0 + $0x8] sm:$0xff]   ;;  %v1313_v20 = vld [vmem:[%s1767_s0 + $0x18] sm:$0xff]  }
   0x6   :  { %v1314_v21 = vld [vmem:[%s1767_s0 + $0x20] sm:$0xff]   ;;  %v1315_v22 = vld [vmem:[%s1767_s0 + $0x28] sm:$0xff]   ;;  %v1316_v23 = vld [vmem:[%s1767_s0 + $0x30] sm:$0xff]  }
   0x7   :  { %339 = vmatpush1.bf16.msra.mxu0 %v1304_v7  ;;  %620 = vmatpush1.bf16.msra.mxu1 %v1305_v8  ;;  %v325_v15 = vsel %vm323_vm0, %v1236_v13, 0  ;;  %v331_v16 = vsel %vm323_vm0, %v1238_v14, 0  ;;  %v1317_v24 = vld [vmem:[%s1767_s0 + $0x38] sm:$0xff]   ;;  %v1318_v25 = vld [vmem:[%s1767_s0 + $0x40] sm:$0xff]   ;;  %v1319_v26 = vld [vmem:[%s1767_s0 + $0x48] sm:$0xff]  }
   0x8   :  { %1240 = vmatprep.subr.msk.bf16.mxu0 %vm323_vm0, %v1237_v11  ;;  %1266 = vmatprep.subr.msk.bf16.mxu1 %vm323_vm0, %v1239_v12  ;;  %v1320_v27 = vld [vmem:[%s1767_s0 + $0x50] sm:$0xff]   ;;  %v1321_v28 = vld [vmem:[%s1767_s0 + $0x58] sm:$0xff]   ;;  %v1322_v29 = vld [vmem:[%s1767_s0 + $0x60] sm:$0xff]  }
   0x9   :  { %v1323_v30 = vld [vmem:[%s1767_s0 + $0x68] sm:$0xff]   ;;  %v1324_v31 = vld [vmem:[%s1767_s0 + $0x70] sm:$0xff]   ;;  %v1325_v32 = vld [vmem:[%s1767_s0 + $0x78] sm:$0xff]  }
   0xa   :  { %v1326_v33 = vld [vmem:[%s1767_s0 + $0x80] sm:$0xff]   ;;  %v1327_v34 = vld [vmem:[%s1767_s0 + $0x88] sm:$0xff]   ;;  %v1328_v35 = vld [vmem:[%s1767_s0 + $0x90] sm:$0xff]  }
   0xb   :  { %341 = vmatpush1.bf16.msra.mxu0 %v325_v15  ;;  %622 = vmatpush1.bf16.msra.mxu1 %v331_v16  ;;  %v1329_v36 = vld [vmem:[%s1767_s0 + $0x98] sm:$0xff]   ;;  %v1330_v37 = vld [vmem:[%s1767_s0 + $0xa0] sm:$0xff]   ;;  %v1331_v38 = vld [vmem:[%s1767_s0 + $0xa8] sm:$0xff]  }
   0xc   :  { %v1332_v39 = vld [vmem:[%s1767_s0 + $0xb0] sm:$0xff]   ;;  %v1333_v40 = vld [vmem:[%s1767_s0 + $0xb8] sm:$0xff]   ;;  %v1334_v41 = vld [vmem:[%s1767_s0 + $0xc0] ss:$0 sps:$4 sm:$0xff]  }
   0xd   :  { %v1568_v50 = vld [vmem:[%s1768_s2] ss:$0 sm:$0xff] }
   0xe   :  { %1241 = vmatmul.mubr.msk.bf16.vlgmr.msra.gmra.mrb[0].mxu0 %vm247_vm1, %v1310_v17  ;;  %1267 = vmatmul.mubr.msk.bf16.vlgmr.msra.gmra.mrb[0].mxu1 %vm247_vm1, %v1310_v17 }
   0xf   :  { %378 = vmatprep.mubr.bf16.mxu0 %v1335_v1  ;;  %659 = vmatprep.mubr.bf16.mxu1 %v1335_v1 }
  0x16   :  { %1242 = vmatmul.mubr.msk.bf16.gmra.mrb[4].mxu0 %vm247_vm1, %v1311_v18  ;;  %1268 = vmatmul.mubr.msk.bf16.gmra.mrb[4].mxu1 %vm247_vm1, %v1311_v18 }
  0x17   :  { %388 = vmatprep.mubr.bf16.mxu0 %v1335_v1  ;;  %669 = vmatprep.mubr.bf16.mxu1 %v1335_v1 }
  0x1e   :  { %1243 = vmatmul.mubr.msk.bf16.gmra.mrb[8].mxu0 %vm247_vm1, %v1312_v19  ;;  %1269 = vmatmul.mubr.msk.bf16.gmra.mrb[8].mxu1 %vm247_vm1, %v1312_v19 }
  0x1f   :  { %398 = vmatprep.mubr.bf16.mxu0 %v1335_v1  ;;  %679 = vmatprep.mubr.bf16.mxu1 %v1335_v1 }
  0x26   :  { %1244 = vmatmul.mubr.msk.bf16.gmra.mrb[12].mxu0 %vm247_vm1, %v1313_v20  ;;  %1270 = vmatmul.mubr.msk.bf16.gmra.mrb[12].mxu1 %vm247_vm1, %v1313_v20 }
  0x27   :  { %408 = vmatprep.mubr.bf16.mxu0 %v1335_v1  ;;  %689 = vmatprep.mubr.bf16.mxu1 %v1335_v1 }
  0x2e   :  { %1245 = vmatmul.mubr.msk.bf16.gmra.mrb[16].mxu0 %vm247_vm1, %v1314_v21  ;;  %1271 = vmatmul.mubr.msk.bf16.gmra.mrb[16].mxu1 %vm247_vm1, %v1314_v21 }
  0x2f   :  { %418 = vmatprep.mubr.bf16.mxu0 %v1335_v1  ;;  %699 = vmatprep.mubr.bf16.mxu1 %v1335_v1 }
  0x36   :  { %1246 = vmatmul.mubr.msk.bf16.gmra.mrb[20].mxu0 %vm247_vm1, %v1315_v22  ;;  %1272 = vmatmul.mubr.msk.bf16.gmra.mrb[20].mxu1 %vm247_vm1, %v1315_v22 }
  0x37   :  { %428 = vmatprep.mubr.bf16.mxu0 %v1335_v1  ;;  %709 = vmatprep.mubr.bf16.mxu1 %v1335_v1 }
  0x3e   :  { %1247 = vmatmul.mubr.msk.bf16.gmra.mrb[24].mxu0 %vm247_vm1, %v1316_v23  ;;  %1273 = vmatmul.mubr.msk.bf16.gmra.mrb[24].mxu1 %vm247_vm1, %v1316_v23 }
  0x3f   :  { %438 = vmatprep.mubr.bf16.mxu0 %v1335_v1  ;;  %719 = vmatprep.mubr.bf16.mxu1 %v1335_v1 }
  0x46   :  { %1248 = vmatmul.mubr.msk.bf16.gmra.mrb[28].mxu0 %vm247_vm1, %v1317_v24  ;;  %1274 = vmatmul.mubr.msk.bf16.gmra.mrb[28].mxu1 %vm247_vm1, %v1317_v24 }
  0x47   :  { %448 = vmatprep.mubr.bf16.mxu0 %v1335_v1  ;;  %729 = vmatprep.mubr.bf16.mxu1 %v1335_v1 }
  0x4e   :  { %1249 = vmatmul.mubr.msk.bf16.gmra.mrb[32].mxu0 %vm247_vm1, %v1318_v25  ;;  %1275 = vmatmul.mubr.msk.bf16.gmra.mrb[32].mxu1 %vm247_vm1, %v1318_v25 }
  0x4f   :  { %458 = vmatprep.mubr.bf16.mxu0 %v1335_v1  ;;  %739 = vmatprep.mubr.bf16.mxu1 %v1335_v1 }
  0x56   :  { %1250 = vmatmul.mubr.msk.bf16.gmra.mrb[36].mxu0 %vm247_vm1, %v1319_v26  ;;  %1276 = vmatmul.mubr.msk.bf16.gmra.mrb[36].mxu1 %vm247_vm1, %v1319_v26 }
  0x57   :  { %468 = vmatprep.mubr.bf16.mxu0 %v1335_v1  ;;  %749 = vmatprep.mubr.bf16.mxu1 %v1335_v1 }
  0x5e   :  { %1251 = vmatmul.mubr.msk.bf16.gmra.mrb[40].mxu0 %vm247_vm1, %v1320_v27  ;;  %1277 = vmatmul.mubr.msk.bf16.gmra.mrb[40].mxu1 %vm247_vm1, %v1320_v27 }
  0x5f   :  { %478 = vmatprep.mubr.bf16.mxu0 %v1335_v1  ;;  %759 = vmatprep.mubr.bf16.mxu1 %v1335_v1 }
  0x66   :  { %1252 = vmatmul.mubr.msk.bf16.gmra.mrb[44].mxu0 %vm247_vm1, %v1321_v28  ;;  %1278 = vmatmul.mubr.msk.bf16.gmra.mrb[44].mxu1 %vm247_vm1, %v1321_v28 }
  0x67   :  { %488 = vmatprep.mubr.bf16.mxu0 %v1335_v1  ;;  %769 = vmatprep.mubr.bf16.mxu1 %v1335_v1 }
  0x6e   :  { %1253 = vmatmul.mubr.msk.bf16.gmra.mrb[48].mxu0 %vm247_vm1, %v1322_v29  ;;  %1279 = vmatmul.mubr.msk.bf16.gmra.mrb[48].mxu1 %vm247_vm1, %v1322_v29 }
  0x6f   :  { %498 = vmatprep.mubr.bf16.mxu0 %v1335_v1  ;;  %779 = vmatprep.mubr.bf16.mxu1 %v1335_v1 }
  0x76   :  { %1254 = vmatmul.mubr.msk.bf16.gmra.mrb[52].mxu0 %vm247_vm1, %v1323_v30  ;;  %1280 = vmatmul.mubr.msk.bf16.gmra.mrb[52].mxu1 %vm247_vm1, %v1323_v30 }
  0x77   :  { %508 = vmatprep.mubr.bf16.mxu0 %v1335_v1  ;;  %789 = vmatprep.mubr.bf16.mxu1 %v1335_v1 }
  0x7e   :  { %1255 = vmatmul.mubr.msk.bf16.gmra.mrb[56].mxu0 %vm247_vm1, %v1324_v31  ;;  %1281 = vmatmul.mubr.msk.bf16.gmra.mrb[56].mxu1 %vm247_vm1, %v1324_v31 }
  0x7f   :  { %518 = vmatprep.mubr.bf16.mxu0 %v1335_v1  ;;  %799 = vmatprep.mubr.bf16.mxu1 %v1335_v1 }
  0x86   :  { %1256 = vmatmul.mubr.msk.bf16.gmra.mrb[60].mxu0 %vm247_vm1, %v1325_v32  ;;  %1282 = vmatmul.mubr.msk.bf16.gmra.mrb[60].mxu1 %vm247_vm1, %v1325_v32 }
  0x87   :  { %528 = vmatprep.mubr.bf16.mxu0 %v1335_v1  ;;  %809 = vmatprep.mubr.bf16.mxu1 %v1335_v1 }
  0x8e   :  { %1257 = vmatmul.mubr.msk.bf16.gmra.mrb[64].mxu0 %vm247_vm1, %v1326_v33  ;;  %1283 = vmatmul.mubr.msk.bf16.gmra.mrb[64].mxu1 %vm247_vm1, %v1326_v33 }
  0x8f   :  { %538 = vmatprep.mubr.bf16.mxu0 %v1335_v1  ;;  %819 = vmatprep.mubr.bf16.mxu1 %v1335_v1 }
  0x96   :  { %1258 = vmatmul.mubr.msk.bf16.gmra.mrb[68].mxu0 %vm247_vm1, %v1327_v34  ;;  %1284 = vmatmul.mubr.msk.bf16.gmra.mrb[68].mxu1 %vm247_vm1, %v1327_v34 }
  0x97   :  { %548 = vmatprep.mubr.bf16.mxu0 %v1335_v1  ;;  %829 = vmatprep.mubr.bf16.mxu1 %v1335_v1 }
  0x9e   :  { %1259 = vmatmul.mubr.msk.bf16.gmra.mrb[72].mxu0 %vm247_vm1, %v1328_v35  ;;  %1285 = vmatmul.mubr.msk.bf16.gmra.mrb[72].mxu1 %vm247_vm1, %v1328_v35 }
  0x9f   :  { %558 = vmatprep.mubr.bf16.mxu0 %v1335_v1  ;;  %839 = vmatprep.mubr.bf16.mxu1 %v1335_v1 }
  0xa6   :  { %1260 = vmatmul.mubr.msk.bf16.gmra.mrb[76].mxu0 %vm247_vm1, %v1329_v36  ;;  %1286 = vmatmul.mubr.msk.bf16.gmra.mrb[76].mxu1 %vm247_vm1, %v1329_v36 }
  0xa7   :  { %568 = vmatprep.mubr.bf16.mxu0 %v1335_v1  ;;  %849 = vmatprep.mubr.bf16.mxu1 %v1335_v1 }
  0xae   :  { %1261 = vmatmul.mubr.msk.bf16.gmra.mrb[80].mxu0 %vm247_vm1, %v1330_v37  ;;  %1287 = vmatmul.mubr.msk.bf16.gmra.mrb[80].mxu1 %vm247_vm1, %v1330_v37 }
  0xaf   :  { %578 = vmatprep.mubr.bf16.mxu0 %v1335_v1  ;;  %859 = vmatprep.mubr.bf16.mxu1 %v1335_v1 }
  0xb6   :  { %1262 = vmatmul.mubr.msk.bf16.gmra.mrb[84].mxu0 %vm247_vm1, %v1331_v38  ;;  %1288 = vmatmul.mubr.msk.bf16.gmra.mrb[84].mxu1 %vm247_vm1, %v1331_v38 }
  0xb7   :  { %588 = vmatprep.mubr.bf16.mxu0 %v1335_v1  ;;  %869 = vmatprep.mubr.bf16.mxu1 %v1335_v1 }
  0xbe   :  { %1263 = vmatmul.mubr.msk.bf16.gmra.mrb[88].mxu0 %vm247_vm1, %v1332_v39  ;;  %1289 = vmatmul.mubr.msk.bf16.gmra.mrb[88].mxu1 %vm247_vm1, %v1332_v39 }
  0xbf   :  { %598 = vmatprep.mubr.bf16.mxu0 %v1335_v1  ;;  %879 = vmatprep.mubr.bf16.mxu1 %v1335_v1 }
  0xc6   :  { %1264 = vmatmul.mubr.msk.bf16.gmra.mrb[92].mxu0 %vm247_vm1, %v1333_v40  ;;  %1290 = vmatmul.mubr.msk.bf16.gmra.mrb[92].mxu1 %vm247_vm1, %v1333_v40 }
  0xc7   :  { %608 = vmatprep.mubr.bf16.mxu0 %v1335_v1  ;;  %889 = vmatprep.mubr.bf16.mxu1 %v1335_v1 }
  0xce   :  { %1265 = vmatmul.mubr.msk.bf16.gmra.mrb[96].mxu0 %vm247_vm1, %v1334_v41  ;;  %1291 = vmatmul.mubr.msk.bf16.gmra.mrb[96].mxu1 %vm247_vm1, %v1334_v41 }
  0xe1   :  { %v370_v42 = vpop.f32.mrb[0].mxu0  ;;  %v651_v43 = vpop.f32.mrb[0].mxu1 }
  0xe2   :  { %v372_v44 = vpop.f32.mrb[1].mxu0  ;;  %v653_v45 = vpop.f32.mrb[1].mxu1 }
  0xe3   :  { %v898_v46 = vmax.f32 %v370_v42, %v372_v44  ;;  %v947_v47 = vmax.f32 %v651_v43, %v653_v45  ;;  %v374_v48 = vpop.f32.mrb[2].mxu0  ;;  %v655_v49 = vpop.f32.mrb[2].mxu1 }
  0xe4   :  { %v376_v51 = vpop.f32.mrb[3].mxu0  ;;  %v657_v52 = vpop.f32.mrb[3].mxu1 }
  0xe5   :  { %v996_v53 = vmax.f32 %v898_v46, %v947_v47  ;;  %v899_v54 = vmax.f32 %v374_v48, %v376_v51  ;;  %v948_v55 = vmax.f32 %v655_v49, %v657_v52 }
  0xe7   :  { %v1052_v56 = vadd.f32 %v1568_v50, %v996_v53  ;;  %v997_v57 = vmax.f32 %v899_v54, %v948_v55 }
  0xe9   :  { %v1101_v58 = vmax.f32 %v1052_v56, 0.0  ;;  %v1053_v59 = vadd.f32 %v1568_v50, %v997_v57  ;;  %v380_v60 = vpop.f32.mrb[4].mxu0  ;;  %v661_v61 = vpop.f32.mrb[4].mxu1 }
  0xea   :  { %v382_v62 = vpop.f32.mrb[5].mxu0  ;;  %v663_v63 = vpop.f32.mrb[5].mxu1 }
  0xeb   :  { %1150 = vst [vmem:[%s1769_s3] sm:$0xff] %v1101_v58  ;;  %v1102_v0 = vmax.f32 %v1053_v59, 0.0  ;;  %v900_v1 = vmax.f32 %v380_v60, %v382_v62  ;;  %v949_v2 = vmax.f32 %v661_v61, %v663_v63  ;;  %v384_v3 = vpop.f32.mrb[6].mxu0  ;;  %v665_v4 = vpop.f32.mrb[6].mxu1 }
  0xec   :  { %v386_v5 = vpop.f32.mrb[7].mxu0  ;;  %v667_v6 = vpop.f32.mrb[7].mxu1 }
  0xed   :  { %1151 = vst [vmem:[%s1769_s3 + $0x8] sm:$0xff] %v1102_v0  ;;  %v998_v7 = vmax.f32 %v900_v1, %v949_v2  ;;  %v901_v8 = vmax.f32 %v384_v3, %v386_v5  ;;  %v950_v9 = vmax.f32 %v665_v4, %v667_v6 }
  0xef   :  { %v1054_v10 = vadd.f32 %v1568_v50, %v998_v7  ;;  %v999_v11 = vmax.f32 %v901_v8, %v950_v9 }
  0xf1   :  { %v1103_v12 = vmax.f32 %v1054_v10, 0.0  ;;  %v1055_v13 = vadd.f32 %v1568_v50, %v999_v11  ;;  %v390_v14 = vpop.f32.mrb[8].mxu0  ;;  %v671_v15 = vpop.f32.mrb[8].mxu1 }
  0xf2   :  { %v392_v16 = vpop.f32.mrb[9].mxu0  ;;  %v673_v17 = vpop.f32.mrb[9].mxu1 }
  0xf3   :  { %1152 = vst [vmem:[%s1769_s3 + $0x10] sm:$0xff] %v1103_v12  ;;  %v1104_v18 = vmax.f32 %v1055_v13, 0.0  ;;  %v902_v19 = vmax.f32 %v390_v14, %v392_v16  ;;  %v951_v20 = vmax.f32 %v671_v15, %v673_v17  ;;  %v394_v21 = vpop.f32.mrb[10].mxu0  ;;  %v675_v22 = vpop.f32.mrb[10].mxu1 }
  0xf4   :  { %v396_v23 = vpop.f32.mrb[11].mxu0  ;;  %v677_v24 = vpop.f32.mrb[11].mxu1 }
  0xf5   :  { %1153 = vst [vmem:[%s1769_s3 + $0x18] sm:$0xff] %v1104_v18  ;;  %v1000_v25 = vmax.f32 %v902_v19, %v951_v20  ;;  %v903_v26 = vmax.f32 %v394_v21, %v396_v23  ;;  %v952_v27 = vmax.f32 %v675_v22, %v677_v24 }
  0xf7   :  { %v1056_v28 = vadd.f32 %v1568_v50, %v1000_v25  ;;  %v1001_v29 = vmax.f32 %v903_v26, %v952_v27 }
  0xf9   :  { %v1105_v30 = vmax.f32 %v1056_v28, 0.0  ;;  %v1057_v31 = vadd.f32 %v1568_v50, %v1001_v29  ;;  %v400_v32 = vpop.f32.mrb[12].mxu0  ;;  %v681_v33 = vpop.f32.mrb[12].mxu1 }
  0xfa   :  { %v402_v34 = vpop.f32.mrb[13].mxu0  ;;  %v683_v35 = vpop.f32.mrb[13].mxu1 }
  0xfb   :  { %1154 = vst [vmem:[%s1769_s3 + $0x20] sm:$0xff] %v1105_v30  ;;  %v1106_v36 = vmax.f32 %v1057_v31, 0.0  ;;  %v904_v37 = vmax.f32 %v400_v32, %v402_v34  ;;  %v953_v38 = vmax.f32 %v681_v33, %v683_v35  ;;  %v404_v39 = vpop.f32.mrb[14].mxu0  ;;  %v685_v40 = vpop.f32.mrb[14].mxu1 }
  0xfc   :  { %v406_v41 = vpop.f32.mrb[15].mxu0  ;;  %v687_v42 = vpop.f32.mrb[15].mxu1 }
  0xfd   :  { %1155 = vst [vmem:[%s1769_s3 + $0x28] sm:$0xff] %v1106_v36  ;;  %v1002_v43 = vmax.f32 %v904_v37, %v953_v38  ;;  %v905_v44 = vmax.f32 %v404_v39, %v406_v41  ;;  %v954_v45 = vmax.f32 %v685_v40, %v687_v42 }
  0xff   :  { %v1058_v46 = vadd.f32 %v1568_v50, %v1002_v43  ;;  %v1003_v47 = vmax.f32 %v905_v44, %v954_v45 }
 0x101   :  { %v1107_v48 = vmax.f32 %v1058_v46, 0.0  ;;  %v1059_v49 = vadd.f32 %v1568_v50, %v1003_v47  ;;  %v410_v51 = vpop.f32.mrb[16].mxu0  ;;  %v691_v52 = vpop.f32.mrb[16].mxu1 }
 0x102   :  { %v412_v53 = vpop.f32.mrb[17].mxu0  ;;  %v693_v54 = vpop.f32.mrb[17].mxu1 }
 0x103   :  { %1156 = vst [vmem:[%s1769_s3 + $0x30] sm:$0xff] %v1107_v48  ;;  %v1108_v55 = vmax.f32 %v1059_v49, 0.0  ;;  %v906_v56 = vmax.f32 %v410_v51, %v412_v53  ;;  %v955_v57 = vmax.f32 %v691_v52, %v693_v54  ;;  %v414_v58 = vpop.f32.mrb[18].mxu0  ;;  %v695_v59 = vpop.f32.mrb[18].mxu1 }
 0x104   :  { %v416_v60 = vpop.f32.mrb[19].mxu0  ;;  %v697_v61 = vpop.f32.mrb[19].mxu1 }
 0x105   :  { %1157 = vst [vmem:[%s1769_s3 + $0x38] sm:$0xff] %v1108_v55  ;;  %v1004_v62 = vmax.f32 %v906_v56, %v955_v57  ;;  %v907_v63 = vmax.f32 %v414_v58, %v416_v60  ;;  %v956_v0 = vmax.f32 %v695_v59, %v697_v61 }
 0x107   :  { %v1060_v1 = vadd.f32 %v1568_v50, %v1004_v62  ;;  %v1005_v2 = vmax.f32 %v907_v63, %v956_v0 }
 0x109   :  { %v1109_v3 = vmax.f32 %v1060_v1, 0.0  ;;  %v1061_v4 = vadd.f32 %v1568_v50, %v1005_v2  ;;  %v420_v5 = vpop.f32.mrb[20].mxu0  ;;  %v701_v6 = vpop.f32.mrb[20].mxu1 }
 0x10a   :  { %v422_v7 = vpop.f32.mrb[21].mxu0  ;;  %v703_v8 = vpop.f32.mrb[21].mxu1 }
 0x10b   :  { %1158 = vst [vmem:[%s1769_s3 + $0x40] sm:$0xff] %v1109_v3  ;;  %v1110_v9 = vmax.f32 %v1061_v4, 0.0  ;;  %v908_v10 = vmax.f32 %v420_v5, %v422_v7  ;;  %v957_v11 = vmax.f32 %v701_v6, %v703_v8  ;;  %v424_v12 = vpop.f32.mrb[22].mxu0  ;;  %v705_v13 = vpop.f32.mrb[22].mxu1 }
 0x10c   :  { %v426_v14 = vpop.f32.mrb[23].mxu0  ;;  %v707_v15 = vpop.f32.mrb[23].mxu1 }
 0x10d   :  { %1159 = vst [vmem:[%s1769_s3 + $0x48] sm:$0xff] %v1110_v9  ;;  %v1006_v16 = vmax.f32 %v908_v10, %v957_v11  ;;  %v909_v17 = vmax.f32 %v424_v12, %v426_v14  ;;  %v958_v18 = vmax.f32 %v705_v13, %v707_v15 }
 0x10f   :  { %v1062_v19 = vadd.f32 %v1568_v50, %v1006_v16  ;;  %v1007_v20 = vmax.f32 %v909_v17, %v958_v18 }
 0x111   :  { %v1111_v21 = vmax.f32 %v1062_v19, 0.0  ;;  %v1063_v22 = vadd.f32 %v1568_v50, %v1007_v20  ;;  %v430_v23 = vpop.f32.mrb[24].mxu0  ;;  %v711_v24 = vpop.f32.mrb[24].mxu1 }
 0x112   :  { %v432_v25 = vpop.f32.mrb[25].mxu0  ;;  %v713_v26 = vpop.f32.mrb[25].mxu1 }
 0x113   :  { %1160 = vst [vmem:[%s1769_s3 + $0x50] sm:$0xff] %v1111_v21  ;;  %v1112_v27 = vmax.f32 %v1063_v22, 0.0  ;;  %v910_v28 = vmax.f32 %v430_v23, %v432_v25  ;;  %v959_v29 = vmax.f32 %v711_v24, %v713_v26  ;;  %v434_v30 = vpop.f32.mrb[26].mxu0  ;;  %v715_v31 = vpop.f32.mrb[26].mxu1 }
 0x114   :  { %v436_v32 = vpop.f32.mrb[27].mxu0  ;;  %v717_v33 = vpop.f32.mrb[27].mxu1 }
 0x115   :  { %1161 = vst [vmem:[%s1769_s3 + $0x58] sm:$0xff] %v1112_v27  ;;  %v1008_v34 = vmax.f32 %v910_v28, %v959_v29  ;;  %v911_v35 = vmax.f32 %v434_v30, %v436_v32  ;;  %v960_v36 = vmax.f32 %v715_v31, %v717_v33 }
 0x117   :  { %v1064_v37 = vadd.f32 %v1568_v50, %v1008_v34  ;;  %v1009_v38 = vmax.f32 %v911_v35, %v960_v36 }
 0x119   :  { %v1113_v39 = vmax.f32 %v1064_v37, 0.0  ;;  %v1065_v40 = vadd.f32 %v1568_v50, %v1009_v38  ;;  %v440_v41 = vpop.f32.mrb[28].mxu0  ;;  %v721_v42 = vpop.f32.mrb[28].mxu1 }
 0x11a   :  { %v442_v43 = vpop.f32.mrb[29].mxu0  ;;  %v723_v44 = vpop.f32.mrb[29].mxu1 }
 0x11b   :  { %1162 = vst [vmem:[%s1769_s3 + $0x60] sm:$0xff] %v1113_v39  ;;  %v1114_v45 = vmax.f32 %v1065_v40, 0.0  ;;  %v912_v46 = vmax.f32 %v440_v41, %v442_v43  ;;  %v961_v47 = vmax.f32 %v721_v42, %v723_v44  ;;  %v444_v48 = vpop.f32.mrb[30].mxu0  ;;  %v725_v49 = vpop.f32.mrb[30].mxu1 }
 0x11c   :  { %v446_v51 = vpop.f32.mrb[31].mxu0  ;;  %v727_v52 = vpop.f32.mrb[31].mxu1 }
 0x11d   :  { %1163 = vst [vmem:[%s1769_s3 + $0x68] sm:$0xff] %v1114_v45  ;;  %v1010_v53 = vmax.f32 %v912_v46, %v961_v47  ;;  %v913_v54 = vmax.f32 %v444_v48, %v446_v51  ;;  %v962_v55 = vmax.f32 %v725_v49, %v727_v52 }
 0x11f   :  { %v1066_v56 = vadd.f32 %v1568_v50, %v1010_v53  ;;  %v1011_v57 = vmax.f32 %v913_v54, %v962_v55 }
 0x121   :  { %v1115_v58 = vmax.f32 %v1066_v56, 0.0  ;;  %v1067_v59 = vadd.f32 %v1568_v50, %v1011_v57  ;;  %v450_v60 = vpop.f32.mrb[32].mxu0  ;;  %v731_v61 = vpop.f32.mrb[32].mxu1 }
 0x122   :  { %v452_v62 = vpop.f32.mrb[33].mxu0  ;;  %v733_v63 = vpop.f32.mrb[33].mxu1 }
 0x123   :  { %1164 = vst [vmem:[%s1769_s3 + $0x70] sm:$0xff] %v1115_v58  ;;  %v1116_v0 = vmax.f32 %v1067_v59, 0.0  ;;  %v914_v1 = vmax.f32 %v450_v60, %v452_v62  ;;  %v963_v2 = vmax.f32 %v731_v61, %v733_v63  ;;  %v454_v3 = vpop.f32.mrb[34].mxu0  ;;  %v735_v4 = vpop.f32.mrb[34].mxu1 }
 0x124   :  { %v456_v5 = vpop.f32.mrb[35].mxu0  ;;  %v737_v6 = vpop.f32.mrb[35].mxu1 }
 0x125   :  { %1165 = vst [vmem:[%s1769_s3 + $0x78] sm:$0xff] %v1116_v0  ;;  %v1012_v7 = vmax.f32 %v914_v1, %v963_v2  ;;  %v915_v8 = vmax.f32 %v454_v3, %v456_v5  ;;  %v964_v9 = vmax.f32 %v735_v4, %v737_v6 }
 0x127   :  { %v1068_v10 = vadd.f32 %v1568_v50, %v1012_v7  ;;  %v1013_v11 = vmax.f32 %v915_v8, %v964_v9 }
 0x129   :  { %v1117_v12 = vmax.f32 %v1068_v10, 0.0  ;;  %v1069_v13 = vadd.f32 %v1568_v50, %v1013_v11  ;;  %v460_v14 = vpop.f32.mrb[36].mxu0  ;;  %v741_v15 = vpop.f32.mrb[36].mxu1 }
 0x12a   :  { %v462_v16 = vpop.f32.mrb[37].mxu0  ;;  %v743_v17 = vpop.f32.mrb[37].mxu1 }
 0x12b   :  { %1166 = vst [vmem:[%s1769_s3 + $0x80] sm:$0xff] %v1117_v12  ;;  %v1118_v18 = vmax.f32 %v1069_v13, 0.0  ;;  %v916_v19 = vmax.f32 %v460_v14, %v462_v16  ;;  %v965_v20 = vmax.f32 %v741_v15, %v743_v17  ;;  %v464_v21 = vpop.f32.mrb[38].mxu0  ;;  %v745_v22 = vpop.f32.mrb[38].mxu1 }
 0x12c   :  { %v466_v23 = vpop.f32.mrb[39].mxu0  ;;  %v747_v24 = vpop.f32.mrb[39].mxu1 }
 0x12d   :  { %1167 = vst [vmem:[%s1769_s3 + $0x88] sm:$0xff] %v1118_v18  ;;  %v1014_v25 = vmax.f32 %v916_v19, %v965_v20  ;;  %v917_v26 = vmax.f32 %v464_v21, %v466_v23  ;;  %v966_v27 = vmax.f32 %v745_v22, %v747_v24 }
 0x12f   :  { %v1070_v28 = vadd.f32 %v1568_v50, %v1014_v25  ;;  %v1015_v29 = vmax.f32 %v917_v26, %v966_v27 }
 0x131   :  { %v1119_v30 = vmax.f32 %v1070_v28, 0.0  ;;  %v1071_v31 = vadd.f32 %v1568_v50, %v1015_v29  ;;  %v470_v32 = vpop.f32.mrb[40].mxu0  ;;  %v751_v33 = vpop.f32.mrb[40].mxu1 }
 0x132   :  { %v472_v34 = vpop.f32.mrb[41].mxu0  ;;  %v753_v35 = vpop.f32.mrb[41].mxu1 }
 0x133   :  { %1168 = vst [vmem:[%s1769_s3 + $0x90] sm:$0xff] %v1119_v30  ;;  %v1120_v36 = vmax.f32 %v1071_v31, 0.0  ;;  %v918_v37 = vmax.f32 %v470_v32, %v472_v34  ;;  %v967_v38 = vmax.f32 %v751_v33, %v753_v35  ;;  %v474_v39 = vpop.f32.mrb[42].mxu0  ;;  %v755_v40 = vpop.f32.mrb[42].mxu1 }
 0x134   :  { %v476_v41 = vpop.f32.mrb[43].mxu0  ;;  %v757_v42 = vpop.f32.mrb[43].mxu1 }
 0x135   :  { %1169 = vst [vmem:[%s1769_s3 + $0x98] sm:$0xff] %v1120_v36  ;;  %v1016_v43 = vmax.f32 %v918_v37, %v967_v38  ;;  %v919_v44 = vmax.f32 %v474_v39, %v476_v41  ;;  %v968_v45 = vmax.f32 %v755_v40, %v757_v42 }
 0x137   :  { %v1072_v46 = vadd.f32 %v1568_v50, %v1016_v43  ;;  %v1017_v47 = vmax.f32 %v919_v44, %v968_v45 }
 0x139   :  { %v1121_v48 = vmax.f32 %v1072_v46, 0.0  ;;  %v1073_v49 = vadd.f32 %v1568_v50, %v1017_v47  ;;  %v480_v51 = vpop.f32.mrb[44].mxu0  ;;  %v761_v52 = vpop.f32.mrb[44].mxu1 }
 0x13a   :  { %v482_v53 = vpop.f32.mrb[45].mxu0  ;;  %v763_v54 = vpop.f32.mrb[45].mxu1 }
 0x13b   :  { %1170 = vst [vmem:[%s1769_s3 + $0xa0] sm:$0xff] %v1121_v48  ;;  %v1122_v55 = vmax.f32 %v1073_v49, 0.0  ;;  %v920_v56 = vmax.f32 %v480_v51, %v482_v53  ;;  %v969_v57 = vmax.f32 %v761_v52, %v763_v54  ;;  %v484_v58 = vpop.f32.mrb[46].mxu0  ;;  %v765_v59 = vpop.f32.mrb[46].mxu1 }
 0x13c   :  { %v486_v60 = vpop.f32.mrb[47].mxu0  ;;  %v767_v61 = vpop.f32.mrb[47].mxu1 }
 0x13d   :  { %1171 = vst [vmem:[%s1769_s3 + $0xa8] sm:$0xff] %v1122_v55  ;;  %v1018_v62 = vmax.f32 %v920_v56, %v969_v57  ;;  %v921_v63 = vmax.f32 %v484_v58, %v486_v60  ;;  %v970_v0 = vmax.f32 %v765_v59, %v767_v61 }
 0x13f   :  { %v1074_v1 = vadd.f32 %v1568_v50, %v1018_v62  ;;  %v1019_v2 = vmax.f32 %v921_v63, %v970_v0 }
 0x141   :  { %v1123_v3 = vmax.f32 %v1074_v1, 0.0  ;;  %v1075_v4 = vadd.f32 %v1568_v50, %v1019_v2  ;;  %v490_v5 = vpop.f32.mrb[48].mxu0  ;;  %v771_v6 = vpop.f32.mrb[48].mxu1 }
 0x142   :  { %v492_v7 = vpop.f32.mrb[49].mxu0  ;;  %v773_v8 = vpop.f32.mrb[49].mxu1 }
 0x143   :  { %1172 = vst [vmem:[%s1769_s3 + $0xb0] sm:$0xff] %v1123_v3  ;;  %v1124_v9 = vmax.f32 %v1075_v4, 0.0  ;;  %v922_v10 = vmax.f32 %v490_v5, %v492_v7  ;;  %v971_v11 = vmax.f32 %v771_v6, %v773_v8  ;;  %v494_v12 = vpop.f32.mrb[50].mxu0  ;;  %v775_v13 = vpop.f32.mrb[50].mxu1 }
 0x144   :  { %v496_v14 = vpop.f32.mrb[51].mxu0  ;;  %v777_v15 = vpop.f32.mrb[51].mxu1 }
 0x145   :  { %1173 = vst [vmem:[%s1769_s3 + $0xb8] sm:$0xff] %v1124_v9  ;;  %v1020_v16 = vmax.f32 %v922_v10, %v971_v11  ;;  %v923_v17 = vmax.f32 %v494_v12, %v496_v14  ;;  %v972_v18 = vmax.f32 %v775_v13, %v777_v15 }
 0x147   :  { %v1076_v19 = vadd.f32 %v1568_v50, %v1020_v16  ;;  %v1021_v20 = vmax.f32 %v923_v17, %v972_v18 }
 0x149   :  { %v1125_v21 = vmax.f32 %v1076_v19, 0.0  ;;  %v1077_v22 = vadd.f32 %v1568_v50, %v1021_v20  ;;  %v500_v23 = vpop.f32.mrb[52].mxu0  ;;  %v781_v24 = vpop.f32.mrb[52].mxu1 }
 0x14a   :  { %v502_v25 = vpop.f32.mrb[53].mxu0  ;;  %v783_v26 = vpop.f32.mrb[53].mxu1 }
 0x14b   :  { %1174 = vst [vmem:[%s1769_s3 + $0xc0] sm:$0xff] %v1125_v21  ;;  %v1126_v27 = vmax.f32 %v1077_v22, 0.0  ;;  %v924_v28 = vmax.f32 %v500_v23, %v502_v25  ;;  %v973_v29 = vmax.f32 %v781_v24, %v783_v26  ;;  %v504_v30 = vpop.f32.mrb[54].mxu0  ;;  %v785_v31 = vpop.f32.mrb[54].mxu1 }
 0x14c   :  { %v506_v32 = vpop.f32.mrb[55].mxu0  ;;  %v787_v33 = vpop.f32.mrb[55].mxu1 }
 0x14d   :  { %1175 = vst [vmem:[%s1769_s3 + $0xc8] sm:$0xff] %v1126_v27  ;;  %v1022_v34 = vmax.f32 %v924_v28, %v973_v29  ;;  %v925_v35 = vmax.f32 %v504_v30, %v506_v32  ;;  %v974_v36 = vmax.f32 %v785_v31, %v787_v33 }
 0x14f   :  { %v1078_v37 = vadd.f32 %v1568_v50, %v1022_v34  ;;  %v1023_v38 = vmax.f32 %v925_v35, %v974_v36 }
 0x151   :  { %v1127_v39 = vmax.f32 %v1078_v37, 0.0  ;;  %v1079_v40 = vadd.f32 %v1568_v50, %v1023_v38  ;;  %v510_v41 = vpop.f32.mrb[56].mxu0  ;;  %v791_v42 = vpop.f32.mrb[56].mxu1 }
 0x152   :  { %v512_v43 = vpop.f32.mrb[57].mxu0  ;;  %v793_v44 = vpop.f32.mrb[57].mxu1 }
 0x153   :  { %1176 = vst [vmem:[%s1769_s3 + $0xd0] sm:$0xff] %v1127_v39  ;;  %v1128_v45 = vmax.f32 %v1079_v40, 0.0  ;;  %v926_v46 = vmax.f32 %v510_v41, %v512_v43  ;;  %v975_v47 = vmax.f32 %v791_v42, %v793_v44  ;;  %v514_v48 = vpop.f32.mrb[58].mxu0  ;;  %v795_v49 = vpop.f32.mrb[58].mxu1 }
 0x154   :  { %v516_v51 = vpop.f32.mrb[59].mxu0  ;;  %v797_v52 = vpop.f32.mrb[59].mxu1 }
 0x155   :  { %1177 = vst [vmem:[%s1769_s3 + $0xd8] sm:$0xff] %v1128_v45  ;;  %v1024_v53 = vmax.f32 %v926_v46, %v975_v47  ;;  %v927_v54 = vmax.f32 %v514_v48, %v516_v51  ;;  %v976_v55 = vmax.f32 %v795_v49, %v797_v52 }
 0x157   :  { %v1080_v56 = vadd.f32 %v1568_v50, %v1024_v53  ;;  %v1025_v57 = vmax.f32 %v927_v54, %v976_v55 }
 0x159   :  { %v1129_v58 = vmax.f32 %v1080_v56, 0.0  ;;  %v1081_v59 = vadd.f32 %v1568_v50, %v1025_v57  ;;  %v520_v60 = vpop.f32.mrb[60].mxu0  ;;  %v801_v61 = vpop.f32.mrb[60].mxu1 }
 0x15a   :  { %v522_v62 = vpop.f32.mrb[61].mxu0  ;;  %v803_v63 = vpop.f32.mrb[61].mxu1 }
 0x15b   :  { %1178 = vst [vmem:[%s1769_s3 + $0xe0] sm:$0xff] %v1129_v58  ;;  %v1130_v0 = vmax.f32 %v1081_v59, 0.0  ;;  %v928_v1 = vmax.f32 %v520_v60, %v522_v62  ;;  %v977_v2 = vmax.f32 %v801_v61, %v803_v63  ;;  %v524_v3 = vpop.f32.mrb[62].mxu0  ;;  %v805_v4 = vpop.f32.mrb[62].mxu1 }
 0x15c   :  { %v526_v5 = vpop.f32.mrb[63].mxu0  ;;  %v807_v6 = vpop.f32.mrb[63].mxu1 }
 0x15d   :  { %1179 = vst [vmem:[%s1769_s3 + $0xe8] sm:$0xff] %v1130_v0  ;;  %v1026_v7 = vmax.f32 %v928_v1, %v977_v2  ;;  %v929_v8 = vmax.f32 %v524_v3, %v526_v5  ;;  %v978_v9 = vmax.f32 %v805_v4, %v807_v6 }
 0x15f   :  { %v1082_v10 = vadd.f32 %v1568_v50, %v1026_v7  ;;  %v1027_v11 = vmax.f32 %v929_v8, %v978_v9 }
 0x161   :  { %v1131_v12 = vmax.f32 %v1082_v10, 0.0  ;;  %v1083_v13 = vadd.f32 %v1568_v50, %v1027_v11  ;;  %v530_v14 = vpop.f32.mrb[64].mxu0  ;;  %v811_v15 = vpop.f32.mrb[64].mxu1 }
 0x162   :  { %v532_v16 = vpop.f32.mrb[65].mxu0  ;;  %v813_v17 = vpop.f32.mrb[65].mxu1 }
 0x163   :  { %1180 = vst [vmem:[%s1769_s3 + $0xf0] sm:$0xff] %v1131_v12  ;;  %v1132_v18 = vmax.f32 %v1083_v13, 0.0  ;;  %v930_v19 = vmax.f32 %v530_v14, %v532_v16  ;;  %v979_v20 = vmax.f32 %v811_v15, %v813_v17  ;;  %v534_v21 = vpop.f32.mrb[66].mxu0  ;;  %v815_v22 = vpop.f32.mrb[66].mxu1 }
 0x164   :  { %v536_v23 = vpop.f32.mrb[67].mxu0  ;;  %v817_v24 = vpop.f32.mrb[67].mxu1 }
 0x165   :  { %1181 = vst [vmem:[%s1769_s3 + $0xf8] sm:$0xff] %v1132_v18  ;;  %v1028_v25 = vmax.f32 %v930_v19, %v979_v20  ;;  %v931_v26 = vmax.f32 %v534_v21, %v536_v23  ;;  %v980_v27 = vmax.f32 %v815_v22, %v817_v24 }
 0x167   :  { %v1084_v28 = vadd.f32 %v1568_v50, %v1028_v25  ;;  %v1029_v29 = vmax.f32 %v931_v26, %v980_v27 }
 0x169   :  { %v1133_v30 = vmax.f32 %v1084_v28, 0.0  ;;  %v1085_v31 = vadd.f32 %v1568_v50, %v1029_v29  ;;  %v540_v32 = vpop.f32.mrb[68].mxu0  ;;  %v821_v33 = vpop.f32.mrb[68].mxu1 }
 0x16a   :  { %v542_v34 = vpop.f32.mrb[69].mxu0  ;;  %v823_v35 = vpop.f32.mrb[69].mxu1 }
 0x16b   :  { %1182 = vst [vmem:[%s1769_s3 + $0x100] sm:$0xff] %v1133_v30  ;;  %v1134_v36 = vmax.f32 %v1085_v31, 0.0  ;;  %v932_v37 = vmax.f32 %v540_v32, %v542_v34  ;;  %v981_v38 = vmax.f32 %v821_v33, %v823_v35  ;;  %v544_v39 = vpop.f32.mrb[70].mxu0  ;;  %v825_v40 = vpop.f32.mrb[70].mxu1 }
 0x16c   :  { %v546_v41 = vpop.f32.mrb[71].mxu0  ;;  %v827_v42 = vpop.f32.mrb[71].mxu1 }
 0x16d   :  { %1183 = vst [vmem:[%s1769_s3 + $0x108] sm:$0xff] %v1134_v36  ;;  %v1030_v43 = vmax.f32 %v932_v37, %v981_v38  ;;  %v933_v44 = vmax.f32 %v544_v39, %v546_v41  ;;  %v982_v45 = vmax.f32 %v825_v40, %v827_v42 }
 0x16f   :  { %v1086_v46 = vadd.f32 %v1568_v50, %v1030_v43  ;;  %v1031_v47 = vmax.f32 %v933_v44, %v982_v45 }
 0x171   :  { %v1135_v48 = vmax.f32 %v1086_v46, 0.0  ;;  %v1087_v49 = vadd.f32 %v1568_v50, %v1031_v47  ;;  %v550_v51 = vpop.f32.mrb[72].mxu0  ;;  %v831_v52 = vpop.f32.mrb[72].mxu1 }
 0x172   :  { %v552_v53 = vpop.f32.mrb[73].mxu0  ;;  %v833_v54 = vpop.f32.mrb[73].mxu1 }
 0x173   :  { %1184 = vst [vmem:[%s1769_s3 + $0x110] sm:$0xff] %v1135_v48  ;;  %v1136_v55 = vmax.f32 %v1087_v49, 0.0  ;;  %v934_v56 = vmax.f32 %v550_v51, %v552_v53  ;;  %v983_v57 = vmax.f32 %v831_v52, %v833_v54  ;;  %v554_v58 = vpop.f32.mrb[74].mxu0  ;;  %v835_v59 = vpop.f32.mrb[74].mxu1 }
 0x174   :  { %v556_v60 = vpop.f32.mrb[75].mxu0  ;;  %v837_v61 = vpop.f32.mrb[75].mxu1 }
 0x175   :  { %1185 = vst [vmem:[%s1769_s3 + $0x118] sm:$0xff] %v1136_v55  ;;  %v1032_v62 = vmax.f32 %v934_v56, %v983_v57  ;;  %v935_v63 = vmax.f32 %v554_v58, %v556_v60  ;;  %v984_v0 = vmax.f32 %v835_v59, %v837_v61 }
 0x177   :  { %v1088_v1 = vadd.f32 %v1568_v50, %v1032_v62  ;;  %v1033_v2 = vmax.f32 %v935_v63, %v984_v0 }
 0x179   :  { %v1137_v3 = vmax.f32 %v1088_v1, 0.0  ;;  %v1089_v4 = vadd.f32 %v1568_v50, %v1033_v2  ;;  %v560_v5 = vpop.f32.mrb[76].mxu0  ;;  %v841_v6 = vpop.f32.mrb[76].mxu1 }
 0x17a   :  { %v562_v7 = vpop.f32.mrb[77].mxu0  ;;  %v843_v8 = vpop.f32.mrb[77].mxu1 }
 0x17b   :  { %1186 = vst [vmem:[%s1769_s3 + $0x120] sm:$0xff] %v1137_v3  ;;  %v1138_v9 = vmax.f32 %v1089_v4, 0.0  ;;  %v936_v10 = vmax.f32 %v560_v5, %v562_v7  ;;  %v985_v11 = vmax.f32 %v841_v6, %v843_v8  ;;  %v564_v12 = vpop.f32.mrb[78].mxu0  ;;  %v845_v13 = vpop.f32.mrb[78].mxu1 }
 0x17c   :  { %v566_v14 = vpop.f32.mrb[79].mxu0  ;;  %v847_v15 = vpop.f32.mrb[79].mxu1 }
 0x17d   :  { %1187 = vst [vmem:[%s1769_s3 + $0x128] sm:$0xff] %v1138_v9  ;;  %v1034_v16 = vmax.f32 %v936_v10, %v985_v11  ;;  %v937_v17 = vmax.f32 %v564_v12, %v566_v14  ;;  %v986_v18 = vmax.f32 %v845_v13, %v847_v15 }
 0x17f   :  { %v1090_v19 = vadd.f32 %v1568_v50, %v1034_v16  ;;  %v1035_v20 = vmax.f32 %v937_v17, %v986_v18 }
 0x181   :  { %v1139_v21 = vmax.f32 %v1090_v19, 0.0  ;;  %v1091_v22 = vadd.f32 %v1568_v50, %v1035_v20  ;;  %v570_v23 = vpop.f32.mrb[80].mxu0  ;;  %v851_v24 = vpop.f32.mrb[80].mxu1 }
 0x182   :  { %v572_v25 = vpop.f32.mrb[81].mxu0  ;;  %v853_v26 = vpop.f32.mrb[81].mxu1 }
 0x183   :  { %1188 = vst [vmem:[%s1769_s3 + $0x130] sm:$0xff] %v1139_v21  ;;  %v1140_v27 = vmax.f32 %v1091_v22, 0.0  ;;  %v938_v28 = vmax.f32 %v570_v23, %v572_v25  ;;  %v987_v29 = vmax.f32 %v851_v24, %v853_v26  ;;  %v574_v30 = vpop.f32.mrb[82].mxu0  ;;  %v855_v31 = vpop.f32.mrb[82].mxu1 }
 0x184   :  { %v576_v32 = vpop.f32.mrb[83].mxu0  ;;  %v857_v33 = vpop.f32.mrb[83].mxu1 }
 0x185   :  { %1189 = vst [vmem:[%s1769_s3 + $0x138] sm:$0xff] %v1140_v27  ;;  %v1036_v34 = vmax.f32 %v938_v28, %v987_v29  ;;  %v939_v35 = vmax.f32 %v574_v30, %v576_v32  ;;  %v988_v36 = vmax.f32 %v855_v31, %v857_v33 }
 0x187   :  { %v1092_v37 = vadd.f32 %v1568_v50, %v1036_v34  ;;  %v1037_v38 = vmax.f32 %v939_v35, %v988_v36 }
 0x189   :  { %v1141_v39 = vmax.f32 %v1092_v37, 0.0  ;;  %v1093_v40 = vadd.f32 %v1568_v50, %v1037_v38  ;;  %v580_v41 = vpop.f32.mrb[84].mxu0  ;;  %v861_v42 = vpop.f32.mrb[84].mxu1 }
 0x18a   :  { %v582_v43 = vpop.f32.mrb[85].mxu0  ;;  %v863_v44 = vpop.f32.mrb[85].mxu1 }
 0x18b   :  { %1190 = vst [vmem:[%s1769_s3 + $0x140] sm:$0xff] %v1141_v39  ;;  %v1142_v45 = vmax.f32 %v1093_v40, 0.0  ;;  %v940_v46 = vmax.f32 %v580_v41, %v582_v43  ;;  %v989_v47 = vmax.f32 %v861_v42, %v863_v44  ;;  %v584_v48 = vpop.f32.mrb[86].mxu0  ;;  %v865_v49 = vpop.f32.mrb[86].mxu1 }
 0x18c   :  { %v586_v51 = vpop.f32.mrb[87].mxu0  ;;  %v867_v52 = vpop.f32.mrb[87].mxu1 }
 0x18d   :  { %1191 = vst [vmem:[%s1769_s3 + $0x148] sm:$0xff] %v1142_v45  ;;  %v1038_v53 = vmax.f32 %v940_v46, %v989_v47  ;;  %v941_v54 = vmax.f32 %v584_v48, %v586_v51  ;;  %v990_v55 = vmax.f32 %v865_v49, %v867_v52 }
 0x18f   :  { %v1094_v56 = vadd.f32 %v1568_v50, %v1038_v53  ;;  %v1039_v57 = vmax.f32 %v941_v54, %v990_v55 }
 0x191   :  { %v1143_v58 = vmax.f32 %v1094_v56, 0.0  ;;  %v1095_v59 = vadd.f32 %v1568_v50, %v1039_v57  ;;  %v590_v60 = vpop.f32.mrb[88].mxu0  ;;  %v871_v61 = vpop.f32.mrb[88].mxu1 }
 0x192   :  { %v592_v62 = vpop.f32.mrb[89].mxu0  ;;  %v873_v63 = vpop.f32.mrb[89].mxu1 }
 0x193   :  { %1192 = vst [vmem:[%s1769_s3 + $0x150] sm:$0xff] %v1143_v58  ;;  %v1144_v0 = vmax.f32 %v1095_v59, 0.0  ;;  %v942_v1 = vmax.f32 %v590_v60, %v592_v62  ;;  %v991_v2 = vmax.f32 %v871_v61, %v873_v63  ;;  %v594_v3 = vpop.f32.mrb[90].mxu0  ;;  %v875_v4 = vpop.f32.mrb[90].mxu1 }
 0x194   :  { %v596_v5 = vpop.f32.mrb[91].mxu0  ;;  %v877_v6 = vpop.f32.mrb[91].mxu1 }
 0x195   :  { %1193 = vst [vmem:[%s1769_s3 + $0x158] sm:$0xff] %v1144_v0  ;;  %v1040_v7 = vmax.f32 %v942_v1, %v991_v2  ;;  %v943_v8 = vmax.f32 %v594_v3, %v596_v5  ;;  %v992_v9 = vmax.f32 %v875_v4, %v877_v6 }
 0x197   :  { %v1096_v10 = vadd.f32 %v1568_v50, %v1040_v7  ;;  %v1041_v11 = vmax.f32 %v943_v8, %v992_v9 }
 0x199   :  { %v1145_v12 = vmax.f32 %v1096_v10, 0.0  ;;  %v1097_v13 = vadd.f32 %v1568_v50, %v1041_v11  ;;  %v600_v14 = vpop.f32.mrb[92].mxu0  ;;  %v881_v15 = vpop.f32.mrb[92].mxu1 }
 0x19a   :  { %v602_v16 = vpop.f32.mrb[93].mxu0  ;;  %v883_v17 = vpop.f32.mrb[93].mxu1 }
 0x19b   :  { %1194 = vst [vmem:[%s1769_s3 + $0x160] sm:$0xff] %v1145_v12  ;;  %v1146_v18 = vmax.f32 %v1097_v13, 0.0  ;;  %v944_v19 = vmax.f32 %v600_v14, %v602_v16  ;;  %v993_v20 = vmax.f32 %v881_v15, %v883_v17  ;;  %v604_v21 = vpop.f32.mrb[94].mxu0  ;;  %v885_v22 = vpop.f32.mrb[94].mxu1 }
 0x19c   :  { %v606_v23 = vpop.f32.mrb[95].mxu0  ;;  %v887_v24 = vpop.f32.mrb[95].mxu1 }
 0x19d   :  { %1195 = vst [vmem:[%s1769_s3 + $0x168] sm:$0xff] %v1146_v18  ;;  %v1042_v25 = vmax.f32 %v944_v19, %v993_v20  ;;  %v945_v26 = vmax.f32 %v604_v21, %v606_v23  ;;  %v994_v27 = vmax.f32 %v885_v22, %v887_v24 }
 0x19f   :  { %v1098_v28 = vadd.f32 %v1568_v50, %v1042_v25  ;;  %v1043_v29 = vmax.f32 %v945_v26, %v994_v27 }
 0x1a1   :  { %v1147_v30 = vmax.f32 %v1098_v28, 0.0  ;;  %v1099_v31 = vadd.f32 %v1568_v50, %v1043_v29  ;;  %v610_v32 = vpop.f32.mrb[96].mxu0  ;;  %v891_v33 = vpop.f32.mrb[96].mxu1 }
 0x1a2   :  { %v612_v34 = vpop.f32.mrb[97].mxu0  ;;  %v893_v35 = vpop.f32.mrb[97].mxu1 }
 0x1a3   :  { %1196 = vst [vmem:[%s1769_s3 + $0x170] sm:$0xff] %v1147_v30  ;;  %v1148_v36 = vmax.f32 %v1099_v31, 0.0  ;;  %v946_v37 = vmax.f32 %v610_v32, %v612_v34  ;;  %v995_v38 = vmax.f32 %v891_v33, %v893_v35  ;;  %v614_v39 = vpop.f32.mrb[98].mxu0  ;;  %v895_v40 = vpop.f32.mrb[98].mxu1 }
 0x1a4   :  { %v615_v41 = vpop.f32.mrb[99].mxu0  ;;  %v896_v42 = vpop.f32.mrb[99].mxu1 }
 0x1a5   :  { %1197 = vst [vmem:[%s1769_s3 + $0x178] sm:$0xff] %v1148_v36  ;;  %v1044_v43 = vmax.f32 %v946_v37, %v995_v38 }
 0x1a7   :  { %v1100_v44 = vadd.f32 %v1568_v50, %v1044_v43 }
 0x1a9   :  { %v1149_v45 = vmax.f32 %v1100_v44, 0.0 }
 0x1ab   :  { %1198 = vst [vmem:[%s1769_s3 + $0x180] sm:$0xff] %v1149_v45 }

// kernel: net_forward.4
= control target key start
LH: loop header
LB: loop body
LE: loop exit
PB: predicated region body
PF: predicated region fallthrough
CT: control target
= control target key end

     0   :  { %vm379_vm0 = vcmask 719872   ;;  %vm392_vm1 = vcmask 1043456   ;;  %s1012_s1 = inlined_call_operand.vmem [shape: bf16[216,512], index: 1, kind: input, shape index: {}]   ;;  %s1013_s0 = inlined_call_operand.vmem [shape: bf16[56,216], index: 0, kind: input, shape index: {}]   ;;  %s1014_s2 = inlined_call_operand.vmem [shape: f32[1,128], index: 2, kind: input, shape index: {}]   ;;  %s1015_s3 = inlined_call_operand.vmem [shape: f32[56,128], index: 3, kind: output, shape index: {}]  }
   0x1   :  { %v675_v0 = vld [vmem:[%s1012_s1 + $0x4] ss:$16 sps:$4 sm:$0xff]   ;;  %v677_v1 = vld [vmem:[%s1012_s1 + $0xc] ss:$16 sps:$4 sm:$0xff]   ;;  %v679_v2 = vld [vmem:[%s1012_s1] ss:$16 sps:$4 sm:$0xff]  }
   0x2   :  { %405 = vmatprep.subr.bf16.mxu0 %v675_v0  ;;  %v680_v3 = vld [vmem:[%s1012_s1 + $0x8] ss:$16 sps:$4 sm:$0xff]   ;;  %476 = vmatprep.subr.bf16.mxu1 %v677_v1  ;;  %v681_v4 = vld [vmem:[%s1012_s1 + $0x24] ss:$16 sps:$4 sm:$0xff]   ;;  %v683_v5 = vld [vmem:[%s1012_s1 + $0x2c] ss:$16 sps:$4 sm:$0xff]  }
   0x3   :  { %406 = vmatpush1.bf16.msra.mxu0 %v679_v2  ;;  %477 = vmatpush1.bf16.msra.mxu1 %v680_v3  ;;  %v685_v6 = vld [vmem:[%s1012_s1 + $0x20] ss:$16 sps:$4 sm:$0xff]   ;;  %v686_v7 = vld [vmem:[%s1012_s1 + $0x28] ss:$16 sps:$4 sm:$0xff]   ;;  %v687_v8 = vld [vmem:[%s1012_s1 + $0x44] ss:$16 sps:$4 sm:$0xff]  }
   0x4   :  { %407 = vmatprep.subr.bf16.mxu0 %v681_v4  ;;  %478 = vmatprep.subr.bf16.mxu1 %v683_v5  ;;  %v689_v9 = vld [vmem:[%s1012_s1 + $0x4c] ss:$16 sps:$4 sm:$0xff]   ;;  %v691_v10 = vld [vmem:[%s1012_s1 + $0x40] ss:$16 sps:$4 sm:$0xff]   ;;  %v692_v11 = vld [vmem:[%s1012_s1 + $0x48] ss:$16 sps:$4 sm:$0xff]  }
   0x5   :  { %v693_v12 = vld [vmem:[%s1012_s1 + $0x64] ss:$16 sps:$4 sm:$0xff]   ;;  %v695_v13 = vld [vmem:[%s1012_s1 + $0x6c] ss:$16 sps:$4 sm:$0xff]   ;;  %v697_v14 = vld [vmem:[%s1012_s1 + $0x60] ss:$16 sps:$4 sm:$0xff]  }
   0x6   :  { %v698_v15 = vld [vmem:[%s1012_s1 + $0x68] ss:$16 sps:$4 sm:$0xff]   ;;  %v699_v16 = vld [vmem:[%s1012_s1 + $0x84] ss:$16 sps:$4 sm:$0xff]   ;;  %v701_v17 = vld [vmem:[%s1012_s1 + $0x8c] ss:$16 sps:$4 sm:$0xff]  }
   0x7   :  { %408 = vmatpush1.bf16.msra.mxu0 %v685_v6  ;;  %479 = vmatpush1.bf16.msra.mxu1 %v686_v7  ;;  %v703_v18 = vld [vmem:[%s1012_s1 + $0x80] ss:$16 sps:$4 sm:$0xff]   ;;  %v704_v19 = vld [vmem:[%s1012_s1 + $0x88] ss:$16 sps:$4 sm:$0xff]   ;;  %v705_v20 = vld [vmem:[%s1012_s1 + $0xa4] ss:$16 sps:$4 sm:$0xff]  }
   0x8   :  { %409 = vmatprep.subr.bf16.mxu0 %v687_v8  ;;  %480 = vmatprep.subr.bf16.mxu1 %v689_v9  ;;  %v707_v21 = vld [vmem:[%s1012_s1 + $0xac] ss:$16 sps:$4 sm:$0xff]   ;;  %v709_v22 = vld [vmem:[%s1012_s1 + $0xa0] ss:$16 sps:$4 sm:$0xff]   ;;  %v710_v23 = vld [vmem:[%s1012_s1 + $0xa8] ss:$16 sps:$4 sm:$0xff]  }
   0x9   :  { %v711_v24 = vld [vmem:[%s1012_s1 + $0xc4] ss:$16 sps:$4 sm:$0xff]   ;;  %v713_v25 = vld [vmem:[%s1012_s1 + $0xcc] ss:$16 sps:$4 sm:$0xff]   ;;  %v715_v26 = vld [vmem:[%s1012_s1 + $0xc0] ss:$16 sps:$4 sm:$0xff]  }
   0xa   :  { %v716_v27 = vld [vmem:[%s1012_s1 + $0xc8] ss:$16 sps:$4 sm:$0xff]   ;;  %v717_v28 = vld [vmem:[%s1012_s1 + $0xe4] ss:$16 sps:$4 sm:$0xff]   ;;  %v719_v29 = vld [vmem:[%s1012_s1 + $0xec] ss:$16 sps:$4 sm:$0xff]  }
   0xb   :  { %410 = vmatpush1.bf16.msra.mxu0 %v691_v10  ;;  %481 = vmatpush1.bf16.msra.mxu1 %v692_v11  ;;  %v721_v30 = vld [vmem:[%s1012_s1 + $0xe0] ss:$16 sps:$4 sm:$0xff]   ;;  %v722_v31 = vld [vmem:[%s1012_s1 + $0xe8] ss:$16 sps:$4 sm:$0xff]   ;;  %v723_v32 = vld [vmem:[%s1012_s1 + $0x104] ss:$16 sps:$4 sm:$0xff]  }
   0xc   :  { %411 = vmatprep.subr.bf16.mxu0 %v693_v12  ;;  %482 = vmatprep.subr.bf16.mxu1 %v695_v13  ;;  %v725_v33 = vld [vmem:[%s1012_s1 + $0x10c] ss:$16 sps:$4 sm:$0xff]   ;;  %v727_v34 = vld [vmem:[%s1012_s1 + $0x100] ss:$16 sps:$4 sm:$0xff]   ;;  %v728_v35 = vld [vmem:[%s1012_s1 + $0x108] ss:$16 sps:$4 sm:$0xff]  }
   0xd   :  { %v729_v36 = vld [vmem:[%s1012_s1 + $0x124] ss:$16 sps:$4 sm:$0xff]   ;;  %v731_v37 = vld [vmem:[%s1012_s1 + $0x12c] ss:$16 sps:$4 sm:$0xff]   ;;  %v733_v38 = vld [vmem:[%s1012_s1 + $0x120] ss:$16 sps:$4 sm:$0xff]  }
   0xe   :  { %v734_v39 = vld [vmem:[%s1012_s1 + $0x128] ss:$16 sps:$4 sm:$0xff]   ;;  %v759_v40 = vld [vmem:[%s1013_s0 + $0x4] ss:$8 sps:$4 sm:$0xff]   ;;  %v739_v43 = vld [vmem:[%s1012_s1 + $0x140] ss:$16 sps:$4 sm:$0xff]  }
   0xf   :  { %412 = vmatpush1.bf16.msra.mxu0 %v697_v14  ;;  %483 = vmatpush1.bf16.msra.mxu1 %v698_v15  ;;  %v735_v41 = vld [vmem:[%s1012_s1 + $0x144] ss:$16 sps:$4 sm:$0xff]   ;;  %v737_v42 = vld [vmem:[%s1012_s1 + $0x14c] ss:$16 sps:$4 sm:$0xff]   ;;  %v740_v44 = vld [vmem:[%s1012_s1 + $0x148] ss:$16 sps:$4 sm:$0xff]  }
  0x10   :  { %413 = vmatprep.subr.bf16.mxu0 %v699_v16  ;;  %484 = vmatprep.subr.bf16.mxu1 %v701_v17  ;;  %v741_v45 = vld [vmem:[%s1012_s1 + $0x164] ss:$16 sps:$4 sm:$0xff]   ;;  %v743_v46 = vld [vmem:[%s1012_s1 + $0x16c] ss:$16 sps:$4 sm:$0xff]   ;;  %v745_v47 = vld [vmem:[%s1012_s1 + $0x160] ss:$16 sps:$4 sm:$0xff]  }
  0x11   :  { %665 = vmatprep.mubr.msk.bf16.mxu0 %vm379_vm0, %v759_v40  ;;  %670 = vmatprep.mubr.msk.bf16.mxu1 %vm379_vm0, %v759_v40  ;;  %v746_v48 = vld [vmem:[%s1012_s1 + $0x168] ss:$16 sps:$4 sm:$0xff]   ;;  %v747_v49 = vld [vmem:[%s1012_s1 + $0x184] ss:$16 sps:$4 sm:$0xff]   ;;  %v749_v50 = vld [vmem:[%s1012_s1 + $0x18c] ss:$16 sps:$4 sm:$0xff]  }
  0x12   :  { %v74_v51 = vld [vmem:[%s1012_s1 + $0x1a0] sm:$0xff]  ;;  %v75_v52 = vld [vmem:[%s1012_s1 + $0x1a8] sm:$0xff]  ;;  %v760_v62 = vld [vmem:[%s1013_s0 + $0x14] ss:$8 sps:$4 sm:$0xff]  }
  0x13   :  { %414 = vmatpush1.bf16.msra.mxu0 %v703_v18  ;;  %485 = vmatpush1.bf16.msra.mxu1 %v704_v19  ;;  %v751_v53 = vld [vmem:[%s1012_s1 + $0x180] ss:$16 sps:$4 sm:$0xff]   ;;  %v752_v54 = vld [vmem:[%s1012_s1 + $0x188] ss:$16 sps:$4 sm:$0xff]   ;;  %v661_v55 = vcombine.high %v74_v51, %v74_v51  ;;  %v663_v56 = vcombine.high %v75_v52, %v75_v52  ;;  %v660_v57 = vcombine.low %v74_v51, %v74_v51  ;;  %v763_v0 = vld [vmem:[%s1013_s0 + $0x24] ss:$8 sps:$4 sm:$0xff]  }
  0x14   :  { %415 = vmatprep.subr.bf16.mxu0 %v705_v20  ;;  %486 = vmatprep.subr.bf16.mxu1 %v707_v21  ;;  %v662_v58 = vcombine.low %v75_v52, %v75_v52  ;;  %v757_v61 = vld [vmem:[%s1013_s0] ss:$8 sps:$4 sm:$0xff]   ;;  %v762_v63 = vld [vmem:[%s1013_s0 + $0x10] ss:$8 sps:$4 sm:$0xff]  }
  0x15   :  { %v394_v59 = vsel %vm392_vm1, %v660_v57, 0  ;;  %v21_v1 = vld [vmem:[%s1013_s0 + $0x30] sm:$0xff]  ;;  %v765_v2 = vld [vmem:[%s1013_s0 + $0x20] ss:$8 sps:$4 sm:$0xff]  }
  0x16   :  { %v400_v60 = vsel %vm392_vm1, %v662_v58, 0  ;;  %v607_v3 = vcombine.high %v21_v1, %v21_v1  ;;  %v606_v4 = vcombine.low %v21_v1, %v21_v1  ;;  %v982_v13 = vld [vmem:[%s1014_s2] ss:$0 sm:$0xff] }
  0x17   :  { %416 = vmatpush1.bf16.msra.mxu0 %v709_v22  ;;  %487 = vmatpush1.bf16.msra.mxu1 %v710_v23 }
  0x18   :  { %417 = vmatprep.subr.bf16.mxu0 %v711_v24  ;;  %488 = vmatprep.subr.bf16.mxu1 %v713_v25 }
  0x1b   :  { %418 = vmatpush1.bf16.msra.mxu0 %v715_v26  ;;  %489 = vmatpush1.bf16.msra.mxu1 %v716_v27 }
  0x1c   :  { %419 = vmatprep.subr.bf16.mxu0 %v717_v28  ;;  %490 = vmatprep.subr.bf16.mxu1 %v719_v29 }
  0x1f   :  { %420 = vmatpush1.bf16.msra.mxu0 %v721_v30  ;;  %491 = vmatpush1.bf16.msra.mxu1 %v722_v31 }
  0x20   :  { %421 = vmatprep.subr.bf16.mxu0 %v723_v32  ;;  %492 = vmatprep.subr.bf16.mxu1 %v725_v33 }
  0x23   :  { %422 = vmatpush1.bf16.msra.mxu0 %v727_v34  ;;  %493 = vmatpush1.bf16.msra.mxu1 %v728_v35 }
  0x24   :  { %423 = vmatprep.subr.bf16.mxu0 %v729_v36  ;;  %494 = vmatprep.subr.bf16.mxu1 %v731_v37 }
  0x27   :  { %424 = vmatpush1.bf16.msra.mxu0 %v733_v38  ;;  %495 = vmatpush1.bf16.msra.mxu1 %v734_v39 }
  0x28   :  { %425 = vmatprep.subr.bf16.mxu0 %v735_v41  ;;  %496 = vmatprep.subr.bf16.mxu1 %v737_v42 }
  0x2b   :  { %426 = vmatpush1.bf16.msra.mxu0 %v739_v43  ;;  %497 = vmatpush1.bf16.msra.mxu1 %v740_v44 }
  0x2c   :  { %427 = vmatprep.subr.bf16.mxu0 %v741_v45  ;;  %498 = vmatprep.subr.bf16.mxu1 %v743_v46 }
  0x2f   :  { %428 = vmatpush1.bf16.msra.mxu0 %v745_v47  ;;  %499 = vmatpush1.bf16.msra.mxu1 %v746_v48 }
  0x30   :  { %429 = vmatprep.subr.bf16.mxu0 %v747_v49  ;;  %500 = vmatprep.subr.bf16.mxu1 %v749_v50 }
  0x33   :  { %430 = vmatpush1.bf16.msra.mxu0 %v751_v53  ;;  %501 = vmatpush1.bf16.msra.mxu1 %v752_v54 }
  0x34   :  { %664 = vmatprep.subr.msk.bf16.mxu0 %vm392_vm1, %v661_v55  ;;  %669 = vmatprep.subr.msk.bf16.mxu1 %vm392_vm1, %v663_v56 }
  0x37   :  { %432 = vmatpush1.bf16.msra.mxu0 %v394_v59  ;;  %503 = vmatpush1.bf16.msra.mxu1 %v400_v60 }
  0x3a   :  { %438 = vmatmul.mubr.bf16.vlgmr.msra.gmra.mrb[0].mxu0 %v757_v61  ;;  %509 = vmatmul.mubr.bf16.vlgmr.msra.gmra.mrb[0].mxu1 %v757_v61 }
  0x3b   :  { %666 = vmatprep.mubr.msk.bf16.mxu0 %vm379_vm0, %v760_v62  ;;  %671 = vmatprep.mubr.msk.bf16.mxu1 %vm379_vm0, %v760_v62 }
  0x42   :  { %448 = vmatmul.mubr.bf16.gmra.mrb[4].mxu0 %v762_v63  ;;  %519 = vmatmul.mubr.bf16.gmra.mrb[4].mxu1 %v762_v63 }
  0x43   :  { %667 = vmatprep.mubr.msk.bf16.mxu0 %vm379_vm0, %v763_v0  ;;  %672 = vmatprep.mubr.msk.bf16.mxu1 %vm379_vm0, %v763_v0 }
  0x4a   :  { %458 = vmatmul.mubr.bf16.gmra.mrb[8].mxu0 %v765_v2  ;;  %529 = vmatmul.mubr.bf16.gmra.mrb[8].mxu1 %v765_v2 }
  0x4b   :  { %668 = vmatprep.mubr.msk.bf16.mxu0 %vm379_vm0, %v607_v3  ;;  %673 = vmatprep.mubr.msk.bf16.mxu1 %vm379_vm0, %v607_v3 }
  0x52   :  { %468 = vmatmul.mubr.bf16.gmra.mrb[12].mxu0 %v606_v4  ;;  %539 = vmatmul.mubr.bf16.gmra.mrb[12].mxu1 %v606_v4 }
 0x10d   :  { %v439_v5 = vpop.f32.mrb[0].mxu0  ;;  %v510_v6 = vpop.f32.mrb[0].mxu1 }
 0x10e   :  { %v441_v7 = vpop.f32.mrb[1].mxu0  ;;  %v512_v8 = vpop.f32.mrb[1].mxu1 }
 0x10f   :  { %v547_v9 = vmax.f32 %v439_v5, %v441_v7  ;;  %v554_v10 = vmax.f32 %v510_v6, %v512_v8  ;;  %v443_v11 = vpop.f32.mrb[2].mxu0  ;;  %v514_v12 = vpop.f32.mrb[2].mxu1 }
 0x110   :  { %v445_v14 = vpop.f32.mrb[3].mxu0  ;;  %v516_v15 = vpop.f32.mrb[3].mxu1 }
 0x111   :  { %v561_v16 = vmax.f32 %v547_v9, %v554_v10  ;;  %v548_v17 = vmax.f32 %v443_v11, %v445_v14  ;;  %v555_v18 = vmax.f32 %v514_v12, %v516_v15 }
 0x113   :  { %v575_v19 = vadd.f32 %v982_v13, %v561_v16  ;;  %v562_v20 = vmax.f32 %v548_v17, %v555_v18 }
 0x115   :  { %v582_v21 = vmax.f32 %v575_v19, 0.0  ;;  %v576_v22 = vadd.f32 %v982_v13, %v562_v20  ;;  %v449_v23 = vpop.f32.mrb[4].mxu0  ;;  %v520_v24 = vpop.f32.mrb[4].mxu1 }
 0x116   :  { %v451_v25 = vpop.f32.mrb[5].mxu0  ;;  %v522_v26 = vpop.f32.mrb[5].mxu1 }
 0x117   :  { %589 = vst [vmem:[%s1015_s3] sm:$0xff] %v582_v21  ;;  %v583_v27 = vmax.f32 %v576_v22, 0.0  ;;  %v549_v28 = vmax.f32 %v449_v23, %v451_v25  ;;  %v556_v29 = vmax.f32 %v520_v24, %v522_v26  ;;  %v453_v30 = vpop.f32.mrb[6].mxu0  ;;  %v524_v31 = vpop.f32.mrb[6].mxu1 }
 0x118   :  { %v455_v32 = vpop.f32.mrb[7].mxu0  ;;  %v526_v33 = vpop.f32.mrb[7].mxu1 }
 0x119   :  { %590 = vst [vmem:[%s1015_s3 + $0x8] sm:$0xff] %v583_v27  ;;  %v563_v34 = vmax.f32 %v549_v28, %v556_v29  ;;  %v550_v35 = vmax.f32 %v453_v30, %v455_v32  ;;  %v557_v36 = vmax.f32 %v524_v31, %v526_v33 }
 0x11b   :  { %v577_v37 = vadd.f32 %v982_v13, %v563_v34  ;;  %v564_v38 = vmax.f32 %v550_v35, %v557_v36 }
 0x11d   :  { %v584_v39 = vmax.f32 %v577_v37, 0.0  ;;  %v578_v40 = vadd.f32 %v982_v13, %v564_v38  ;;  %v459_v41 = vpop.f32.mrb[8].mxu0  ;;  %v530_v42 = vpop.f32.mrb[8].mxu1 }
 0x11e   :  { %v461_v43 = vpop.f32.mrb[9].mxu0  ;;  %v532_v44 = vpop.f32.mrb[9].mxu1 }
 0x11f   :  { %591 = vst [vmem:[%s1015_s3 + $0x10] sm:$0xff] %v584_v39  ;;  %v585_v45 = vmax.f32 %v578_v40, 0.0  ;;  %v551_v46 = vmax.f32 %v459_v41, %v461_v43  ;;  %v558_v47 = vmax.f32 %v530_v42, %v532_v44  ;;  %v463_v48 = vpop.f32.mrb[10].mxu0  ;;  %v534_v49 = vpop.f32.mrb[10].mxu1 }
 0x120   :  { %v465_v50 = vpop.f32.mrb[11].mxu0  ;;  %v536_v51 = vpop.f32.mrb[11].mxu1 }
 0x121   :  { %592 = vst [vmem:[%s1015_s3 + $0x18] sm:$0xff] %v585_v45  ;;  %v565_v52 = vmax.f32 %v551_v46, %v558_v47  ;;  %v552_v53 = vmax.f32 %v463_v48, %v465_v50  ;;  %v559_v54 = vmax.f32 %v534_v49, %v536_v51 }
 0x123   :  { %v579_v55 = vadd.f32 %v982_v13, %v565_v52  ;;  %v566_v56 = vmax.f32 %v552_v53, %v559_v54 }
 0x125   :  { %v586_v57 = vmax.f32 %v579_v55, 0.0  ;;  %v580_v58 = vadd.f32 %v982_v13, %v566_v56  ;;  %v469_v59 = vpop.f32.mrb[12].mxu0  ;;  %v540_v60 = vpop.f32.mrb[12].mxu1 }
 0x126   :  { %v471_v61 = vpop.f32.mrb[13].mxu0  ;;  %v542_v62 = vpop.f32.mrb[13].mxu1 }
 0x127   :  { %593 = vst [vmem:[%s1015_s3 + $0x20] sm:$0xff] %v586_v57  ;;  %v587_v63 = vmax.f32 %v580_v58, 0.0  ;;  %v553_v0 = vmax.f32 %v469_v59, %v471_v61  ;;  %v560_v1 = vmax.f32 %v540_v60, %v542_v62  ;;  %v473_v2 = vpop.f32.mrb[14].mxu0  ;;  %v544_v3 = vpop.f32.mrb[14].mxu1 }
 0x128   :  { %v474_v4 = vpop.f32.mrb[15].mxu0  ;;  %v545_v5 = vpop.f32.mrb[15].mxu1 }
 0x129   :  { %594 = vst [vmem:[%s1015_s3 + $0x28] sm:$0xff] %v587_v63  ;;  %v567_v6 = vmax.f32 %v553_v0, %v560_v1 }
 0x12b   :  { %v581_v7 = vadd.f32 %v982_v13, %v567_v6 }
 0x12d   :  { %v588_v8 = vmax.f32 %v581_v7, 0.0 }
 0x12f   :  { %595 = vst [vmem:[%s1015_s3 + $0x30] sm:$0xff] %v588_v8 }

// kernel: net_forward.5
= control target key start
LH: loop header
LB: loop body
LE: loop exit
PB: predicated region body
PF: predicated region fallthrough
CT: control target
= control target key end

     0   :  { %v677_v2 = vmov 0.0|0.0   ;;  %vm87_vm0 = vcmask 130048   ;;  %vm678_vm1 = vmmov 0   ;;  %s1016_s1 = inlined_call_operand.vmem [shape: f32[400,128], index: 1, kind: input, shape index: {}]   ;;  %s1017_s0 = inlined_call_operand.vmem [shape: f32[8,400], index: 0, kind: input, shape index: {}]   ;;  %s1018_s3 = inlined_call_operand.vmem [shape: f32[128,128], index: 3, kind: input, shape index: {}]   ;;  %s1019_s5 = inlined_call_operand.vmem [shape: f32[128,128], index: 5, kind: input, shape index: {}]   ;;  %s1020_s2 = inlined_call_operand.vmem [shape: f32[1,128], index: 2, kind: input, shape index: {}]   ;;  %s1021_s4 = inlined_call_operand.vmem [shape: f32[1,128], index: 4, kind: input, shape index: {}]   ;;  %s1022_s6 = inlined_call_operand.vmem [shape: f32[1,128], index: 6, kind: input, shape index: {}]   ;;  %s1023_s7 = inlined_call_operand.vmem [shape: f32[8,128], index: 7, kind: output, shape index: {}]  }
   0x1   :  { %v46_v0 = vld [vmem:[%s1016_s1 + $0x80] sm:$0xff]  ;;  %v47_v1 = vld [vmem:[%s1016_s1 + $0x88] sm:$0xff]  ;;  %599 = vmatprep.subr.bf16.mxu1 %v677_v2  ;;  %v48_v10 = vld [vmem:[%s1016_s1 + $0x90] sm:$0xff] }
   0x2   :  { %v30_v3 = vld [vmem:[%s1016_s1] sm:$0xff]  ;;  %v567_v4 = vpack.c.bf16 %v47_v1, %v46_v0  ;;  %v31_v5 = vld [vmem:[%s1016_s1 + $0x8] sm:$0xff]  ;;  %v49_v11 = vld [vmem:[%s1016_s1 + $0x98] sm:$0xff] }
   0x3   :  { %v62_v6 = vld [vmem:[%s1016_s1 + $0x100] sm:$0xff]  ;;  %v63_v7 = vld [vmem:[%s1016_s1 + $0x108] sm:$0xff]  ;;  %v569_v8 = vpack.c.bf16 %v31_v5, %v30_v3  ;;  %v32_v12 = vld [vmem:[%s1016_s1 + $0x10] sm:$0xff]  ;;  %v571_v13 = vpack.c.bf16 %v49_v11, %v48_v10 }
   0x4   :  { %v600_v9 = vpack.c.bf16 %v63_v7, %v62_v6  ;;  %568 = vmatprep.subr.bf16.mxu0 %v567_v4  ;;  %v33_v14 = vld [vmem:[%s1016_s1 + $0x18] sm:$0xff]  ;;  %v64_v15 = vld [vmem:[%s1016_s1 + $0x110] sm:$0xff]  ;;  %v50_v19 = vld [vmem:[%s1016_s1 + $0xa0] sm:$0xff] }
   0x5   :  { %v65_v16 = vld [vmem:[%s1016_s1 + $0x118] sm:$0xff]  ;;  %570 = vmatpush3.bf16.msra.mxu0 %v569_v8  ;;  %v573_v17 = vpack.c.bf16 %v33_v14, %v32_v12  ;;  %v51_v20 = vld [vmem:[%s1016_s1 + $0xa8] sm:$0xff]  ;;  %v34_v21 = vld [vmem:[%s1016_s1 + $0x20] sm:$0xff] }
   0x6   :  { %601 = vmatpush1.bf16.msra.mxu1 %v600_v9  ;;  %v603_v18 = vpack.c.bf16 %v65_v16, %v64_v15  ;;  %572 = vmatprep.subr.bf16.mxu0 %v571_v13  ;;  %v575_v22 = vpack.c.bf16 %v51_v20, %v50_v19  ;;  %v35_v23 = vld [vmem:[%s1016_s1 + $0x28] sm:$0xff]  ;;  %v66_v24 = vld [vmem:[%s1016_s1 + $0x120] sm:$0xff]  ;;  %v52_v26 = vld [vmem:[%s1016_s1 + $0xb0] sm:$0xff] }
   0x7   :  { %602 = vmatprep.subr.bf16.mxu1 %v677_v2  ;;  %v67_v25 = vld [vmem:[%s1016_s1 + $0x128] sm:$0xff]  ;;  %v53_v27 = vld [vmem:[%s1016_s1 + $0xb8] sm:$0xff]  ;;  %v577_v28 = vpack.c.bf16 %v35_v23, %v34_v21  ;;  %v36_v30 = vld [vmem:[%s1016_s1 + $0x30] sm:$0xff] }
   0x8   :  { %v606_v29 = vpack.c.bf16 %v67_v25, %v66_v24  ;;  %v579_v31 = vpack.c.bf16 %v53_v27, %v52_v26  ;;  %v37_v32 = vld [vmem:[%s1016_s1 + $0x38] sm:$0xff]  ;;  %v68_v33 = vld [vmem:[%s1016_s1 + $0x130] sm:$0xff]  ;;  %v54_v35 = vld [vmem:[%s1016_s1 + $0xc0] sm:$0xff] }
   0x9   :  { %574 = vmatpush3.bf16.msra.mxu0 %v573_v17  ;;  %v69_v34 = vld [vmem:[%s1016_s1 + $0x138] sm:$0xff]  ;;  %v55_v36 = vld [vmem:[%s1016_s1 + $0xc8] sm:$0xff]  ;;  %v581_v37 = vpack.c.bf16 %v37_v32, %v36_v30  ;;  %v38_v39 = vld [vmem:[%s1016_s1 + $0x40] sm:$0xff] }
   0xa   :  { %604 = vmatpush1.bf16.msra.mxu1 %v603_v18  ;;  %576 = vmatprep.subr.bf16.mxu0 %v575_v22  ;;  %v609_v38 = vpack.c.bf16 %v69_v34, %v68_v33  ;;  %v583_v40 = vpack.c.bf16 %v55_v36, %v54_v35  ;;  %v39_v41 = vld [vmem:[%s1016_s1 + $0x48] sm:$0xff]  ;;  %v70_v42 = vld [vmem:[%s1016_s1 + $0x140] sm:$0xff]  ;;  %v56_v44 = vld [vmem:[%s1016_s1 + $0xd0] sm:$0xff] }
   0xb   :  { %605 = vmatprep.subr.bf16.mxu1 %v677_v2  ;;  %v71_v43 = vld [vmem:[%s1016_s1 + $0x148] sm:$0xff]  ;;  %v57_v45 = vld [vmem:[%s1016_s1 + $0xd8] sm:$0xff]  ;;  %v585_v46 = vpack.c.bf16 %v39_v41, %v38_v39  ;;  %v40_v48 = vld [vmem:[%s1016_s1 + $0x50] sm:$0xff]  ;;  %v679_v41 = vmov 0.0  }
   0xc   :  { %v612_v47 = vpack.c.bf16 %v71_v43, %v70_v42  ;;  %v41_v49 = vld [vmem:[%s1016_s1 + $0x58] sm:$0xff]  ;;  %v27_v50 = vld [vmem:[%s1017_s0 + $0x8] sm:$0xff]  ;;  %v587_v51 = vpack.c.bf16 %v57_v45, %v56_v44  ;;  %v72_v52 = vld [vmem:[%s1016_s1 + $0x150] sm:$0xff] }
   0xd   :  { %578 = vmatpush3.bf16.msra.mxu0 %v577_v28  ;;  %v73_v53 = vld [vmem:[%s1016_s1 + $0x158] sm:$0xff]  ;;  %v58_v55 = vld [vmem:[%s1016_s1 + $0xe0] sm:$0xff]  ;;  %v59_v56 = vld [vmem:[%s1016_s1 + $0xe8] sm:$0xff]  ;;  %155 = vmatprep.mubr.f32.mxu0 %v27_v50  ;;  %v589_v57 = vpack.c.bf16 %v41_v49, %v40_v48 }
   0xe   :  { %607 = vmatpush1.bf16.msra.mxu1 %v606_v29  ;;  %580 = vmatprep.subr.bf16.mxu0 %v579_v31  ;;  %v29_v54 = vld [vmem:[%s1017_s0 + $0x18] sm:$0xff]  ;;  %v615_v58 = vpack.c.bf16 %v73_v53, %v72_v52  ;;  %v42_v59 = vld [vmem:[%s1016_s1 + $0x60] sm:$0xff]  ;;  %v591_v60 = vpack.c.bf16 %v59_v56, %v58_v55  ;;  %v43_v61 = vld [vmem:[%s1016_s1 + $0x68] sm:$0xff] }
   0xf   :  { %608 = vmatprep.subr.bf16.mxu1 %v677_v2  ;;  %425 = vmatprep.mubr.msk.f32.mxu1 %vm87_vm0, %v29_v54  ;;  %v74_v62 = vld [vmem:[%s1016_s1 + $0x160] sm:$0xff]  ;;  %v75_v63 = vld [vmem:[%s1016_s1 + $0x168] sm:$0xff]  ;;  %v60_v0 = vld [vmem:[%s1016_s1 + $0xf0] sm:$0xff]  ;;  %v593_v3 = vpack.c.bf16 %v43_v61, %v42_v59 }
  0x10   :  { %v61_v1 = vld [vmem:[%s1016_s1 + $0xf8] sm:$0xff]  ;;  %v618_v4 = vpack.c.bf16 %v75_v63, %v74_v62  ;;  %v44_v5 = vld [vmem:[%s1016_s1 + $0x70] sm:$0xff]  ;;  %v78_v12 = vld [vmem:[%s1016_s1 + $0x180] sm:$0xff] }
  0x11   :  { %582 = vmatpush3.bf16.msra.mxu0 %v581_v37  ;;  %v595_v6 = vpack.c.bf16 %v61_v1, %v60_v0  ;;  %v45_v7 = vld [vmem:[%s1016_s1 + $0x78] sm:$0xff]  ;;  %v76_v8 = vld [vmem:[%s1016_s1 + $0x170] sm:$0xff]  ;;  %v79_v13 = vld [vmem:[%s1016_s1 + $0x188] sm:$0xff] }
  0x12   :  { %610 = vmatpush1.bf16.msra.mxu1 %v609_v38  ;;  %584 = vmatprep.subr.bf16.mxu0 %v583_v40  ;;  %v77_v9 = vld [vmem:[%s1016_s1 + $0x178] sm:$0xff]  ;;  %v597_v10 = vpack.c.bf16 %v45_v7, %v44_v5  ;;  %v232_v14 = vld [vmem:[%s1018_s3] sm:$0xff]  ;;  %v233_v15 = vld [vmem:[%s1018_s3 + $0x8] sm:$0xff]  ;;  %v624_v17 = vpack.c.bf16 %v79_v13, %v78_v12 }
  0x13   :  { %611 = vmatprep.subr.bf16.mxu1 %v677_v2  ;;  %v621_v11 = vpack.c.bf16 %v77_v9, %v76_v8  ;;  %v26_v16 = vld [vmem:[%s1017_s0] sm:$0xff]  ;;  %v627_v18 = vpack.c.bf16 %v233_v15, %v232_v14  ;;  %v234_v19 = vld [vmem:[%s1018_s3 + $0x10] sm:$0xff]  ;;  %v235_v20 = vld [vmem:[%s1018_s3 + $0x18] sm:$0xff] }
  0x14   :  { %v28_v21 = vld [vmem:[%s1017_s0 + $0x10] sm:$0xff]  ;;  %v630_v22 = vpack.c.bf16 %v235_v20, %v234_v19  ;;  %v236_v23 = vld [vmem:[%s1018_s3 + $0x20] sm:$0xff]  ;;  %v237_v24 = vld [vmem:[%s1018_s3 + $0x28] sm:$0xff] }
  0x15   :  { %586 = vmatpush3.bf16.msra.mxu0 %v585_v46  ;;  %v633_v25 = vpack.c.bf16 %v237_v24, %v236_v23  ;;  %v238_v26 = vld [vmem:[%s1018_s3 + $0x30] sm:$0xff]  ;;  %v239_v27 = vld [vmem:[%s1018_s3 + $0x38] sm:$0xff]  ;;  %v240_v29 = vld [vmem:[%s1018_s3 + $0x40] sm:$0xff] }
  0x16   :  { %613 = vmatpush1.bf16.msra.mxu1 %v612_v47  ;;  %588 = vmatprep.subr.bf16.mxu0 %v587_v51  ;;  %v636_v28 = vpack.c.bf16 %v239_v27, %v238_v26  ;;  %v241_v30 = vld [vmem:[%s1018_s3 + $0x48] sm:$0xff]  ;;  %v242_v32 = vld [vmem:[%s1018_s3 + $0x50] sm:$0xff]  ;;  %v243_v33 = vld [vmem:[%s1018_s3 + $0x58] sm:$0xff] }
  0x17   :  { %614 = vmatprep.subr.bf16.mxu1 %v677_v2  ;;  %v639_v31 = vpack.c.bf16 %v241_v30, %v240_v29  ;;  %v642_v34 = vpack.c.bf16 %v243_v33, %v242_v32  ;;  %v244_v35 = vld [vmem:[%s1018_s3 + $0x60] sm:$0xff]  ;;  %v245_v36 = vld [vmem:[%s1018_s3 + $0x68] sm:$0xff]  ;;  %v246_v38 = vld [vmem:[%s1018_s3 + $0x70] sm:$0xff] }
  0x18   :  { %v645_v37 = vpack.c.bf16 %v245_v36, %v244_v35  ;;  %v247_v39 = vld [vmem:[%s1018_s3 + $0x78] sm:$0xff]  ;;  %v326_v42 = vld [vmem:[%s1019_s5] sm:$0xff]  ;;  %v327_v43 = vld [vmem:[%s1019_s5 + $0x8] sm:$0xff] }
  0x19   :  { %590 = vmatpush3.bf16.msra.mxu0 %v589_v57  ;;  %v648_v40 = vpack.c.bf16 %v247_v39, %v246_v38  ;;  %v328_v44 = vld [vmem:[%s1019_s5 + $0x10] sm:$0xff]  ;;  %v651_v45 = vpack.c.bf16 %v327_v43, %v326_v42  ;;  %v329_v46 = vld [vmem:[%s1019_s5 + $0x18] sm:$0xff]  ;;  %v330_v48 = vld [vmem:[%s1019_s5 + $0x20] sm:$0xff] }
  0x1a   :  { %616 = vmatpush1.bf16.msra.mxu1 %v615_v58  ;;  %592 = vmatprep.subr.bf16.mxu0 %v591_v60  ;;  %v654_v47 = vpack.c.bf16 %v329_v46, %v328_v44  ;;  %v331_v49 = vld [vmem:[%s1019_s5 + $0x28] sm:$0xff]  ;;  %v332_v51 = vld [vmem:[%s1019_s5 + $0x30] sm:$0xff]  ;;  %v333_v52 = vld [vmem:[%s1019_s5 + $0x38] sm:$0xff] }
  0x1b   :  { %617 = vmatprep.subr.bf16.mxu1 %v677_v2  ;;  %v657_v50 = vpack.c.bf16 %v331_v49, %v330_v48  ;;  %v660_v53 = vpack.c.bf16 %v333_v52, %v332_v51  ;;  %v334_v54 = vld [vmem:[%s1019_s5 + $0x40] sm:$0xff]  ;;  %v335_v55 = vld [vmem:[%s1019_s5 + $0x48] sm:$0xff]  ;;  %v336_v57 = vld [vmem:[%s1019_s5 + $0x50] sm:$0xff] }
  0x1c   :  { %v663_v56 = vpack.c.bf16 %v335_v55, %v334_v54  ;;  %v337_v58 = vld [vmem:[%s1019_s5 + $0x58] sm:$0xff]  ;;  %v338_v60 = vld [vmem:[%s1019_s5 + $0x60] sm:$0xff]  ;;  %v339_v61 = vld [vmem:[%s1019_s5 + $0x68] sm:$0xff] }
  0x1d   :  { %594 = vmatpush3.bf16.msra.mxu0 %v593_v3  ;;  %v666_v59 = vpack.c.bf16 %v337_v58, %v336_v57  ;;  %v669_v62 = vpack.c.bf16 %v339_v61, %v338_v60  ;;  %v424_v1 = vld [vmem:[%s1020_s2] ss:$0 sm:$0xff]  ;;  %v340_v9 = vld [vmem:[%s1019_s5 + $0x70] sm:$0xff] }
  0x1e   :  { %619 = vmatpush1.bf16.msra.mxu1 %v618_v4  ;;  %596 = vmatprep.subr.bf16.mxu0 %v595_v6 }
  0x1f   :  { %620 = vmatprep.subr.bf16.mxu1 %v677_v2 }
  0x21   :  { %598 = vmatpush3.bf16.msra.mxu0 %v597_v10 }
  0x22   :  { %622 = vmatpush1.bf16.msra.mxu1 %v621_v11  ;;  %626 = vmatprep.subr.bf16.mxu0 %v677_v2  ;;  %v426_v11 = vld [vmem:[%s1021_s4] ss:$0 sm:$0xff] }
  0x23   :  { %623 = vmatprep.subr.bf16.mxu1 %v677_v2 }
  0x24   :  { %156 = vmatmul.mubr.f32.vlgmr.msra.gmra.mrb[0].mxu0 %v26_v16  ;;  %v427_v16 = vld [vmem:[%s1022_s6] ss:$0 sm:$0xff] }
  0x25   :  { %628 = vmatpush3.bf16.msra.mxu0 %v627_v18  ;;  %529 = vmatprep.mubr.msk.f32.mxu0 %vm678_vm1, %v679_v41 }
  0x26   :  { %625 = vmatpush1.bf16.msra.mxu1 %v624_v17  ;;  %629 = vmatprep.subr.bf16.mxu0 %v677_v2 }
  0x27   :  { %650 = vmatprep.subr.bf16.mxu1 %v677_v2 }
  0x29   :  { %226 = vmatmul.mubr.f32.vlgmr.msra.gmra.mrb[0].mxu1 %v28_v21  ;;  %631 = vmatpush3.bf16.msra.mxu0 %v630_v22 }
  0x2a   :  { %632 = vmatprep.subr.bf16.mxu0 %v677_v2  ;;  %564 = vmatprep.mubr.msk.f32.mxu1 %vm678_vm1, %v679_v41 }
  0x2b   :  { %652 = vmatpush3.bf16.msra.mxu1 %v651_v45 }
  0x2c   :  { %653 = vmatprep.subr.bf16.mxu1 %v677_v2 }
  0x2d   :  { %634 = vmatpush3.bf16.msra.mxu0 %v633_v25 }
  0x2e   :  { %635 = vmatprep.subr.bf16.mxu0 %v677_v2 }
  0x2f   :  { %655 = vmatpush3.bf16.msra.mxu1 %v654_v47 }
  0x30   :  { %656 = vmatprep.subr.bf16.mxu1 %v677_v2 }
  0x31   :  { %637 = vmatpush3.bf16.msra.mxu0 %v636_v28 }
  0x32   :  { %638 = vmatprep.subr.bf16.mxu0 %v677_v2 }
  0x33   :  { %658 = vmatpush3.bf16.msra.mxu1 %v657_v50 }
  0x34   :  { %659 = vmatprep.subr.bf16.mxu1 %v677_v2 }
  0x35   :  { %640 = vmatpush3.bf16.msra.mxu0 %v639_v31 }
  0x36   :  { %641 = vmatprep.subr.bf16.mxu0 %v677_v2 }
  0x37   :  { %661 = vmatpush3.bf16.msra.mxu1 %v660_v53 }
  0x38   :  { %662 = vmatprep.subr.bf16.mxu1 %v677_v2 }
  0x39   :  { %643 = vmatpush3.bf16.msra.mxu0 %v642_v34 }
  0x3a   :  { %644 = vmatprep.subr.bf16.mxu0 %v677_v2 }
  0x3b   :  { %664 = vmatpush3.bf16.msra.mxu1 %v663_v56 }
  0x3c   :  { %665 = vmatprep.subr.bf16.mxu1 %v677_v2 }
  0x3d   :  { %646 = vmatpush3.bf16.msra.mxu0 %v645_v37 }
  0x3e   :  { %647 = vmatprep.subr.bf16.mxu0 %v677_v2 }
  0x3f   :  { %667 = vmatpush3.bf16.msra.mxu1 %v666_v59 }
  0x40   :  { %668 = vmatprep.subr.bf16.mxu1 %v677_v2 }
  0x41   :  { %649 = vmatpush3.bf16.msra.mxu0 %v648_v40 }
  0x43   :  { %670 = vmatpush3.bf16.msra.mxu1 %v669_v62 }
  0x44   :  { %671 = vmatprep.subr.bf16.mxu1 %v677_v2  ;;  %v341_v2 = vld [vmem:[%s1019_s5 + $0x78] sm:$0xff] }
  0x45   :  { %v672_v10 = vpack.c.bf16 %v341_v2, %v340_v9 }
  0x47   :  { %673 = vmatpush3.bf16.msra.mxu1 %v672_v10 }
  0xf7   :  { %v460_v63 = vpop.f32.mrb[0].mxu0 }
  0xf8   :  { %v461_v0 = vpop.f32.mrb[1].mxu0 }
  0xf9   :  { %v462_v3 = vadd.f32 %v461_v0, %v460_v63 }
  0xfb   :  { %v158_v4 = vadd.f32 %v462_v3, %v424_v1 }
  0xfc   :  { %v227_v5 = vpop.f32.mrb[0].mxu1 }
  0xfd   :  { %v229_v6 = vpop.f32.mrb[1].mxu1  ;;  %v228_v7 = vadd.f32 %v227_v5, %v158_v4 }
  0xff   :  { %v231_v8 = vmax.f32 %v228_v7, 0.0 }
 0x101   :  { %530 = vmatmul.mubr.f32.vlgmr.msra.gmra.mrb[2].mxu0 %v231_v8 }
 0x1d4   :  { %v321_v12 = vpop.f32.mrb[2].mxu0 }
 0x1d5   :  { %v322_v13 = vadd.f32 %v426_v11, %v321_v12  ;;  %v531_v14 = vpop.f32.mrb[3].mxu0 }
 0x1d7   :  { %v325_v15 = vmax.f32 %v322_v13, 0.0 }
 0x1d9   :  { %565 = vmatmul.mubr.f32.vlgmr.msra.gmra.mrb[2].mxu1 %v325_v15 }
 0x2ac   :  { %v415_v17 = vpop.f32.mrb[2].mxu1 }
 0x2ad   :  { %v416_v18 = vadd.f32 %v427_v16, %v415_v17  ;;  %v566_v19 = vpop.f32.mrb[3].mxu1 }
 0x2af   :  { %419 = vst [vmem:[%s1023_s7] sm:$0xff] %v416_v18 }

</bundles_post_ra>
